<compile_context>
chip_gen: v7x
topology: tpu7x:2x2x1
jax: 0.10.0
libtpu: 0.0.40
codegen_flags: <defaults>
</compile_context>

<pallas_src>
import numpy as np
import jax
import jax.numpy as jnp
from jax import lax
from jax.experimental import pallas as pl
from jax.experimental.pallas import tpu as pltpu

EPS = 1e-5                   # BatchNorm2d default eps
MXU_DTYPE = jnp.bfloat16     # conv-matrix / conv-activation dtype at the MXU boundary
LANE = 128


def _round_up(n, m=LANE):
    return ((n + m - 1) // m) * m


# ----------------------------- fused Pallas kernel ---------------------------

def _make_fused_kernel(n_layers, B, F):
    """Ref layout:
       [x_row, (A, red, expm, gamma, beta_row) * n_layers, wfc, bfc, out, hb_scratch]

       x_row    : (1, Nin0_pad)        NCHW-flattened input, lane-dense
       A        : (Nin_pad, Nout_pad)  conv gather + weights folded (bf16)
       red      : (Nout_pad, Cout)     per-channel mean matrix (1/count at valid lanes)
       expm     : (Cout, Nout_pad)     per-channel broadcast-back matrix (0/1)
       gamma    : (1, Cout)            BN weight
       beta_row : (1, Nout_pad)        BN bias pre-broadcast to the row layout
       wfc      : (F, L)  fc1 weight (un-replicated);  bfc : (1, L)
       hb       : (B, F) VMEM scratch  per-sample flattened features
    """
    def kernel(*refs):
        h = refs[0][...]                                       # (1, Nin_pad) f32
        idx = 1
        for _ in range(n_layers):
            a_ref, red_ref, exp_ref, g_ref, beta_ref = refs[idx:idx + 5]
            idx += 5

            # Conv2d (stride/pad gather + channel mixing + kh*kw taps) == one MXU dot,
            # bf16 operands, f32 accumulation.
            y = jnp.dot(h.astype(a_ref.dtype), a_ref[...],
                        preferred_element_type=jnp.float32)    # (1, Nout_pad)

            # BatchNorm2d training batch stats over (N,H,W); two-pass variance in f32.
            red = red_ref[...]
            expm = exp_ref[...]
            mean = jnp.dot(y, red, preferred_element_type=jnp.float32)       # (1, Cout)
            d = y - jnp.dot(mean, expm, preferred_element_type=jnp.float32)  # (1, Nout)
            var = jnp.dot(d * d, red, preferred_element_type=jnp.float32)    # (1, Cout)
            scale = g_ref[...] * lax.rsqrt(var + EPS)
            scale_row = jnp.dot(scale, expm, preferred_element_type=jnp.float32)
            h = jnp.maximum(d * scale_row + beta_ref[...], 0.0)  # fused affine + ReLU
            # Padded lanes: y = 0, mean_row = 0, scale_row = 0, beta_row = 0 -> stay 0.

        wfc_ref = refs[idx]
        bfc_ref = refs[idx + 1]
        o_ref = refs[idx + 2]
        hb_ref = refs[idx + 3]

        # Flatten + fc1: each sample's (C_last * s_sp) features are already contiguous
        # in the row layout, so the (B, F) relayout is B aligned VMEM copies -- no
        # B-tiled weights, no 0/1 batch mask, no masked-zero FLOPs.
        for b in range(B):
            hb_ref[b:b + 1, :] = h[:, b * F:(b + 1) * F]
        mu = jnp.dot(hb_ref[...], wfc_ref[...],
                     preferred_element_type=jnp.float32) + bfc_ref[...]
        o_ref[...] = mu

    return kernel


def vae_oct_forward(x, packed):
    """x: (B, Cin, H, W) NCHW.  Returns mu: (B, latent_dim) == VAE_OCT.forward(x)."""
    n_layers = len(packed["layers"])
    B = x.shape[0]
    F, L = packed["wfc"].shape

    n_in0 = packed["layers"][0]["A"].shape[0]
    row = x.reshape(1, -1).astype(jnp.float32)                 # NCHW flatten (free)
    row = jnp.pad(row, ((0, 0), (0, n_in0 - row.shape[1])))    # lane pad (no-op here)

    inputs = [row]
    for lyr in packed["layers"]:
        inputs += [lyr["A"], lyr["red"], lyr["expm"], lyr["gamma"], lyr["beta_row"]]
    inputs += [packed["wfc"], packed["bfc"]]

    # Advisory cost estimate for the XLA scheduler.
    flops = 2 * B * F * L
    transcendentals = 0
    for lyr in packed["layers"]:
        nin, nout = lyr["A"].shape
        cout = lyr["red"].shape[1]
        flops += 2 * nin * nout + 2 * 2 * nout * cout + 2 * 2 * cout * nout
        transcendentals += cout
    bytes_accessed = sum(int(a.size) * a.dtype.itemsize for a in inputs) + B * L * 4

    vmem = pl.BlockSpec(memory_space=pltpu.MemorySpace.VMEM)
    return pl.pallas_call(
        _make_fused_kernel(n_layers, B, F),
        out_shape=jax.ShapeDtypeStruct((B, L), jnp.float32),
        in_specs=[vmem] * len(inputs),
        out_specs=vmem,
        scratch_shapes=[pltpu.VMEM((B, F), jnp.float32)],
        compiler_params=pltpu.CompilerParams(vmem_limit_bytes=32 * 1024 * 1024),
        cost_estimate=pl.CostEstimate(flops=int(flops),
                                      transcendentals=int(transcendentals),
                                      bytes_accessed=int(bytes_accessed)),
    )(*inputs)


# --------------------------- parameter packing (once) ------------------------

def pack_params(raw, B, n_channels, kernel_size, stride, padding, input_hw):
    """Fold conv gather + weights into one matrix per layer; build BN reduction /
    broadcast matrices; keep fc1 un-replicated.  Done once, off the hot path."""
    kh, kw = kernel_size
    sh, sw = stride
    ph, pw = padding

    dims = [tuple(input_hw)]
    for _ in range(len(n_channels) - 1):
        dims.append(tuple(
            (dims[-1][i] + 2 * padding[i] - kernel_size[i]) // stride[i] + 1
            for i in (0, 1)))

    layers = []
    n_in_pad = _round_up(B * n_channels[0] * dims[0][0] * dims[0][1])
    for l in range(len(n_channels) - 1):
        cin, cout = n_channels[l], n_channels[l + 1]
        hin, win = dims[l]
        hout, wout = dims[l + 1]
        n_out_valid = B * cout * hout * wout
        n_out_pad = _round_up(n_out_valid)

        w = np.asarray(raw["enc"][l]["w"], np.float32)          # (cout, cin, kh, kw)
        A = np.zeros((n_in_pad, n_out_pad), np.float32)
        for b in range(B):
            for co in range(cout):
                for ho in range(hout):
                    for wo in range(wout):
                        n_out = ((b * cout + co) * hout + ho) * wout + wo
                        for ci in range(cin):
                            for i in range(kh):
                                r = ho * sh + i - ph
                                if r < 0 or r >= hin:
                                    continue
                                for j in range(kw):
                                    c = wo * sw + j - pw
                                    if c < 0 or c >= win:
                                        continue
                                    n_in = ((b * cin + ci) * hin + r) * win + c
                                    A[n_in, n_out] += w[co, ci, i, j]

        count = float(B * hout * wout)                          # BN stats over (N,H,W)
        red = np.zeros((n_out_pad, cout), np.float32)
        expm = np.zeros((cout, n_out_pad), np.float32)
        beta_row = np.zeros((1, n_out_pad), np.float32)
        beta = np.asarray(raw["enc"][l]["beta"], np.float32)
        hw = hout * wout
        for b in range(B):
            for co in range(cout):
                base = (b * cout + co) * hw
                red[base:base + hw, co] = 1.0 / count
                expm[co, base:base + hw] = 1.0
                beta_row[0, base:base + hw] = beta[co]

        layers.append(dict(
            A=jnp.asarray(A).astype(MXU_DTYPE),
            red=jnp.asarray(red),
            expm=jnp.asarray(expm),
            gamma=jnp.asarray(raw["enc"][l]["gamma"]).reshape(1, -1).astype(jnp.float32),
            beta_row=jnp.asarray(beta_row),
        ))
        n_in_pad = n_out_pad

    # fc1 weight un-replicated; kept f32 here (final-output accuracy at toy scale);
    # cast to bf16 at realistic F.
    wfc = jnp.asarray(raw["fc1_w"]).T.astype(jnp.float32)       # (F, L)
    bfc = jnp.asarray(raw["fc1_b"]).reshape(1, -1).astype(jnp.float32)
    return dict(layers=layers, wfc=wfc, bfc=bfc)


# --------------------------- raw parameter initialization --------------------

def init_params(key, n_channels, kernel_size, latent_dim, enc_out_features):
    params = {"enc": []}
    kh, kw = kernel_size
    for i in range(len(n_channels) - 1):
        key, k1, k2, k3, k4 = jax.random.split(key, 5)
        cin, cout = n_channels[i], n_channels[i + 1]
        fan_in = cin * kh * kw
        params["enc"].append(dict(
            w=jax.random.normal(k1, (cout, cin, kh, kw), jnp.float32)
            / jnp.sqrt(float(fan_in)),
            b=jax.random.normal(k2, (cout,), jnp.float32) * 0.1,   # dead under train BN
            gamma=1.0 + 0.1 * jax.random.normal(k3, (cout,), jnp.float32),
            beta=0.1 * jax.random.normal(k4, (cout,), jnp.float32),
        ))
    key, k1, k2 = jax.random.split(key, 3)
    params["fc1_w"] = jax.random.normal(
        k1, (latent_dim, enc_out_features), jnp.float32
    ) / jnp.sqrt(float(enc_out_features))
    params["fc1_b"] = jax.random.normal(k2, (latent_dim,), jnp.float32) * 0.1
    return params


# ------------------------------- pure-JAX reference --------------------------

def reference_forward(x, raw, stride, padding):
    h = x
    for p in raw["enc"]:
        y = lax.conv_general_dilated(
            h, p["w"], window_strides=stride,
            padding=[(padding[0], padding[0]), (padding[1], padding[1])],
            dimension_numbers=("NCHW", "OIHW", "NCHW"),
        ) + p["b"].reshape(1, -1, 1, 1)
        mean = jnp.mean(y, axis=(0, 2, 3), keepdims=True)
        var = jnp.mean((y - mean) ** 2, axis=(0, 2, 3), keepdims=True)
        h = jnp.maximum(
            p["gamma"].reshape(1, -1, 1, 1) * (y - mean) * lax.rsqrt(var + EPS)
            + p["beta"].reshape(1, -1, 1, 1),
            0.0,
        )
    h = h.reshape(h.shape[0], -1)
    return h @ raw["fc1_w"].T + raw["fc1_b"]


# ----------------------------------- main -------------------------------------

if __name__ == "__main__":
    # VAE_OCT config (small): input_dim=(1,16,16), n_channels=[1,4,8],
    # kernel_size=(3,3), padding=(1,1), stride=(2,2), latent_dim=16.
    B = 2
    n_channels = [1, 4, 8]
    kernel_size = (3, 3)
    padding = (1, 1)
    stride = (2, 2)
    latent_dim = 16
    H = W = 16

    enc_dim = [(H, W)]
    for _ in range(len(n_channels) - 1):
        enc_dim.append(tuple(
            (enc_dim[-1][i] + 2 * padding[i] - kernel_size[i]) // stride[i] + 1
            for i in (0, 1)))
    enc_out_features = n_channels[-1] * enc_dim[-1][0] * enc_dim[-1][1]

    key = jax.random.PRNGKey(0)
    key, kx = jax.random.split(key)
    x = jax.random.normal(kx, (B, n_channels[0], H, W), jnp.float32)

    raw = init_params(key, n_channels, kernel_size, latent_dim, enc_out_features)
    packed = pack_params(raw, B, n_channels, kernel_size, stride, padding, (H, W))

    fwd = jax.jit(vae_oct_forward)
    mu = jax.block_until_ready(fwd(x, packed))
    mu_ref = jax.block_until_ready(reference_forward(x, raw, stride, padding))

    assert mu.shape == (B, latent_dim), mu.shape
    # bf16 MXU operands on the conv path -> looser tolerance vs the f32 reference.
    max_err = float(jnp.max(jnp.abs(mu - mu_ref)))
    assert jnp.allclose(mu, mu_ref, rtol=5e-2, atol=5e-2), max_err
    print("KERNEL_OK")
</pallas_src>

<mosaic_0001>
module attributes {stable_mosaic.version = 11 : i64} {
  func.func @kernel(%arg0: memref<1x512xf32, #tpu.memory_space<vmem>>, %arg1: memref<512x512xbf16, #tpu.memory_space<vmem>>, %arg2: memref<512x4xf32, #tpu.memory_space<vmem>>, %arg3: memref<4x512xf32, #tpu.memory_space<vmem>>, %arg4: memref<1x4xf32, #tpu.memory_space<vmem>>, %arg5: memref<1x512xf32, #tpu.memory_space<vmem>>, %arg6: memref<512x256xbf16, #tpu.memory_space<vmem>>, %arg7: memref<256x8xf32, #tpu.memory_space<vmem>>, %arg8: memref<8x256xf32, #tpu.memory_space<vmem>>, %arg9: memref<1x8xf32, #tpu.memory_space<vmem>>, %arg10: memref<1x256xf32, #tpu.memory_space<vmem>>, %arg11: memref<128x16xf32, #tpu.memory_space<vmem>>, %arg12: memref<1x16xf32, #tpu.memory_space<vmem>>, %arg13: memref<2x16xf32, #tpu.memory_space<vmem>>, %arg14: memref<2x128xf32, #tpu.memory_space<vmem>>) attributes {dimension_semantics = [], scalar_prefetch = 0 : i64, scratch_operands = 1 : i64, tpu.core_type = #tpu.core_type<tc>} {
    %c0 = arith.constant 0 : index
    %c0_0 = arith.constant 0 : index
    %0 = vector.load %arg0[%c0, %c0_0] : memref<1x512xf32, #tpu.memory_space<vmem>>, vector<1x512xf32>
    %1 = arith.truncf %0 : vector<1x512xf32> to vector<1x512xbf16>
    %c0_1 = arith.constant 0 : index
    %c0_2 = arith.constant 0 : index
    %2 = vector.load %arg1[%c0_1, %c0_2] : memref<512x512xbf16, #tpu.memory_space<vmem>>, vector<512x512xbf16>
    %cst = arith.constant dense<0.000000e+00> : vector<1x512xf32>
    %3 = tpu.matmul %1, %2, %cst {dimension_numbers = #tpu.dot_dimension_numbers<[1], [0], [0], [1], [0, 0, 1, 1], [], []>} : vector<1x512xbf16>, vector<512x512xbf16>, vector<1x512xf32> -> vector<1x512xf32>
    %c0_3 = arith.constant 0 : index
    %c0_4 = arith.constant 0 : index
    %4 = vector.load %arg2[%c0_3, %c0_4] : memref<512x4xf32, #tpu.memory_space<vmem>>, vector<512x4xf32>
    %c0_5 = arith.constant 0 : index
    %c0_6 = arith.constant 0 : index
    %5 = vector.load %arg3[%c0_5, %c0_6] : memref<4x512xf32, #tpu.memory_space<vmem>>, vector<4x512xf32>
    %cst_7 = arith.constant dense<0.000000e+00> : vector<1x4xf32>
    %6 = tpu.matmul %3, %4, %cst_7 {dimension_numbers = #tpu.dot_dimension_numbers<[1], [0], [0], [1], [0, 0, 1, 1], [], []>} : vector<1x512xf32>, vector<512x4xf32>, vector<1x4xf32> -> vector<1x4xf32>
    %cst_8 = arith.constant dense<0.000000e+00> : vector<1x512xf32>
    %7 = tpu.matmul %6, %5, %cst_8 {dimension_numbers = #tpu.dot_dimension_numbers<[1], [0], [0], [1], [0, 0, 1, 1], [], []>} : vector<1x4xf32>, vector<4x512xf32>, vector<1x512xf32> -> vector<1x512xf32>
    %8 = arith.subf %3, %7 : vector<1x512xf32>
    %9 = arith.mulf %8, %8 : vector<1x512xf32>
    %cst_9 = arith.constant dense<0.000000e+00> : vector<1x4xf32>
    %10 = tpu.matmul %9, %4, %cst_9 {dimension_numbers = #tpu.dot_dimension_numbers<[1], [0], [0], [1], [0, 0, 1, 1], [], []>} : vector<1x512xf32>, vector<512x4xf32>, vector<1x4xf32> -> vector<1x4xf32>
    %c0_10 = arith.constant 0 : index
    %c0_11 = arith.constant 0 : index
    %11 = vector.load %arg4[%c0_10, %c0_11] : memref<1x4xf32, #tpu.memory_space<vmem>>, vector<1x4xf32>
    %cst_12 = arith.constant 9.99999974E-6 : f32
    %12 = vector.broadcast %cst_12 : f32 to vector<1x4xf32>
    %13 = arith.addf %10, %12 : vector<1x4xf32>
    %14 = math.rsqrt %13 : vector<1x4xf32>
    %15 = arith.mulf %11, %14 : vector<1x4xf32>
    %cst_13 = arith.constant dense<0.000000e+00> : vector<1x512xf32>
    %16 = tpu.matmul %15, %5, %cst_13 {dimension_numbers = #tpu.dot_dimension_numbers<[1], [0], [0], [1], [0, 0, 1, 1], [], []>} : vector<1x4xf32>, vector<4x512xf32>, vector<1x512xf32> -> vector<1x512xf32>
    %17 = arith.mulf %8, %16 : vector<1x512xf32>
    %c0_14 = arith.constant 0 : index
    %c0_15 = arith.constant 0 : index
    %18 = vector.load %arg5[%c0_14, %c0_15] : memref<1x512xf32, #tpu.memory_space<vmem>>, vector<1x512xf32>
    %19 = arith.addf %17, %18 : vector<1x512xf32>
    %cst_16 = arith.constant 0.000000e+00 : f32
    %20 = vector.broadcast %cst_16 : f32 to vector<1x512xf32>
    %21 = arith.maximumf %19, %20 : vector<1x512xf32>
    %22 = arith.truncf %21 : vector<1x512xf32> to vector<1x512xbf16>
    %c0_17 = arith.constant 0 : index
    %c0_18 = arith.constant 0 : index
    %23 = vector.load %arg6[%c0_17, %c0_18] : memref<512x256xbf16, #tpu.memory_space<vmem>>, vector<512x256xbf16>
    %cst_19 = arith.constant dense<0.000000e+00> : vector<1x256xf32>
    %24 = tpu.matmul %22, %23, %cst_19 {dimension_numbers = #tpu.dot_dimension_numbers<[1], [0], [0], [1], [0, 0, 1, 1], [], []>} : vector<1x512xbf16>, vector<512x256xbf16>, vector<1x256xf32> -> vector<1x256xf32>
    %c0_20 = arith.constant 0 : index
    %c0_21 = arith.constant 0 : index
    %25 = vector.load %arg7[%c0_20, %c0_21] : memref<256x8xf32, #tpu.memory_space<vmem>>, vector<256x8xf32>
    %c0_22 = arith.constant 0 : index
    %c0_23 = arith.constant 0 : index
    %26 = vector.load %arg8[%c0_22, %c0_23] : memref<8x256xf32, #tpu.memory_space<vmem>>, vector<8x256xf32>
    %cst_24 = arith.constant dense<0.000000e+00> : vector<1x8xf32>
    %27 = tpu.matmul %24, %25, %cst_24 {dimension_numbers = #tpu.dot_dimension_numbers<[1], [0], [0], [1], [0, 0, 1, 1], [], []>} : vector<1x256xf32>, vector<256x8xf32>, vector<1x8xf32> -> vector<1x8xf32>
    %cst_25 = arith.constant dense<0.000000e+00> : vector<1x256xf32>
    %28 = tpu.matmul %27, %26, %cst_25 {dimension_numbers = #tpu.dot_dimension_numbers<[1], [0], [0], [1], [0, 0, 1, 1], [], []>} : vector<1x8xf32>, vector<8x256xf32>, vector<1x256xf32> -> vector<1x256xf32>
    %29 = arith.subf %24, %28 : vector<1x256xf32>
    %30 = arith.mulf %29, %29 : vector<1x256xf32>
    %cst_26 = arith.constant dense<0.000000e+00> : vector<1x8xf32>
    %31 = tpu.matmul %30, %25, %cst_26 {dimension_numbers = #tpu.dot_dimension_numbers<[1], [0], [0], [1], [0, 0, 1, 1], [], []>} : vector<1x256xf32>, vector<256x8xf32>, vector<1x8xf32> -> vector<1x8xf32>
    %c0_27 = arith.constant 0 : index
    %c0_28 = arith.constant 0 : index
    %32 = vector.load %arg9[%c0_27, %c0_28] : memref<1x8xf32, #tpu.memory_space<vmem>>, vector<1x8xf32>
    %cst_29 = arith.constant 9.99999974E-6 : f32
    %33 = vector.broadcast %cst_29 : f32 to vector<1x8xf32>
    %34 = arith.addf %31, %33 : vector<1x8xf32>
    %35 = math.rsqrt %34 : vector<1x8xf32>
    %36 = arith.mulf %32, %35 : vector<1x8xf32>
    %cst_30 = arith.constant dense<0.000000e+00> : vector<1x256xf32>
    %37 = tpu.matmul %36, %26, %cst_30 {dimension_numbers = #tpu.dot_dimension_numbers<[1], [0], [0], [1], [0, 0, 1, 1], [], []>} : vector<1x8xf32>, vector<8x256xf32>, vector<1x256xf32> -> vector<1x256xf32>
    %38 = arith.mulf %29, %37 : vector<1x256xf32>
    %c0_31 = arith.constant 0 : index
    %c0_32 = arith.constant 0 : index
    %39 = vector.load %arg10[%c0_31, %c0_32] : memref<1x256xf32, #tpu.memory_space<vmem>>, vector<1x256xf32>
    %40 = arith.addf %38, %39 : vector<1x256xf32>
    %cst_33 = arith.constant 0.000000e+00 : f32
    %41 = vector.broadcast %cst_33 : f32 to vector<1x256xf32>
    %42 = arith.maximumf %40, %41 : vector<1x256xf32>
    %43 = vector.extract_strided_slice %42 {offsets = [0, 0], sizes = [1, 128], strides = [1, 1]} : vector<1x256xf32> to vector<1x128xf32>
    %c0_34 = arith.constant 0 : index
    %c0_35 = arith.constant 0 : index
    %44 = vector.load %arg14[%c0_34, %c0_35] : memref<2x128xf32, #tpu.memory_space<vmem>>, vector<1x128xf32>
    tpu.vector_store %arg14[%c0_34, %c0_35], %43 {strides = array<i32>} : memref<2x128xf32, #tpu.memory_space<vmem>>, vector<1x128xf32>,
    %45 = vector.extract_strided_slice %42 {offsets = [0, 128], sizes = [1, 128], strides = [1, 1]} : vector<1x256xf32> to vector<1x128xf32>
    %c1 = arith.constant 1 : index
    %c0_36 = arith.constant 0 : index
    %46 = vector.load %arg14[%c1, %c0_36] : memref<2x128xf32, #tpu.memory_space<vmem>>, vector<1x128xf32>
    tpu.vector_store %arg14[%c1, %c0_36], %45 {strides = array<i32>} : memref<2x128xf32, #tpu.memory_space<vmem>>, vector<1x128xf32>,
    %c0_37 = arith.constant 0 : index
    %c0_38 = arith.constant 0 : index
    %47 = vector.load %arg14[%c0_37, %c0_38] : memref<2x128xf32, #tpu.memory_space<vmem>>, vector<2x128xf32>
    %c0_39 = arith.constant 0 : index
    %c0_40 = arith.constant 0 : index
    %48 = vector.load %arg11[%c0_39, %c0_40] : memref<128x16xf32, #tpu.memory_space<vmem>>, vector<128x16xf32>
    %cst_41 = arith.constant dense<0.000000e+00> : vector<2x16xf32>
    %49 = tpu.matmul %47, %48, %cst_41 {dimension_numbers = #tpu.dot_dimension_numbers<[1], [0], [0], [1], [0, 0, 1, 1], [], []>} : vector<2x128xf32>, vector<128x16xf32>, vector<2x16xf32> -> vector<2x16xf32>
    %c0_42 = arith.constant 0 : index
    %c0_43 = arith.constant 0 : index
    %50 = vector.load %arg12[%c0_42, %c0_43] : memref<1x16xf32, #tpu.memory_space<vmem>>, vector<1x16xf32>
    %51 = vector.broadcast %50 : vector<1x16xf32> to vector<2x16xf32>
    %52 = arith.addf %49, %51 : vector<2x16xf32>
    %c0_44 = arith.constant 0 : index
    %c0_45 = arith.constant 0 : index
    %53 = vector.load %arg13[%c0_44, %c0_45] : memref<2x16xf32, #tpu.memory_space<vmem>>, vector<2x16xf32>
    tpu.vector_store %arg13[%c0_44, %c0_45], %52 {strides = array<i32>} : memref<2x16xf32, #tpu.memory_space<vmem>>, vector<2x16xf32>,
    return
  }
}

</mosaic_0001>

<bundles_post_ra>
// kernel: vae_oct_forward.1
= control target key start
LH: loop header
LB: loop body
LE: loop exit
PB: predicated region body
PF: predicated region fallthrough
CT: control target
= control target key end

     0   :  { %18 = vsyncpa [#allocation4], 0  ;;  %s4622_s0 = inlined_call_operand.vmem [shape: f32[1,512], index: 0, kind: input, shape index: {}]   ;;  %s4623_s1 = inlined_call_operand.hbm [shape: bf16[512,512], index: 1, kind: input, shape index: {}]   ;;  %s4624_s2 = inlined_call_operand.vmem [shape: f32[512,4], index: 2, kind: input, shape index: {}]   ;;  %s4625_s3 = inlined_call_operand.vmem [shape: f32[4,512], index: 3, kind: input, shape index: {}]   ;;  %s4626_s4 = inlined_call_operand.vmem [shape: f32[1,4], index: 4, kind: input, shape index: {}]   ;;  %s4627_s5 = inlined_call_operand.vmem [shape: f32[1,512], index: 5, kind: input, shape index: {}]   ;;  %s4628_s6 = inlined_call_operand.vmem [shape: bf16[512,256], index: 6, kind: input, shape index: {}]   ;;  %s4629_s7 = inlined_call_operand.vmem [shape: f32[256,8], index: 7, kind: input, shape index: {}]   ;;  %s4630_s8 = inlined_call_operand.vmem [shape: f32[8,256], index: 8, kind: input, shape index: {}]   ;;  %s4631_s9 = inlined_call_operand.vmem [shape: f32[1,8], index: 9, kind: input, shape index: {}]   ;;  %s4632_s10 = inlined_call_operand.vmem [shape: f32[1,256], index: 10, kind: input, shape index: {}]   ;;  %s4633_s11 = inlined_call_operand.vmem [shape: f32[128,16], index: 11, kind: input, shape index: {}]   ;;  %s4634_s12 = inlined_call_operand.vmem [shape: f32[1,16], index: 12, kind: input, shape index: {}]   ;;  %s4635_s13 = inlined_call_operand.hbm [shape: f32[2,16], index: 13, kind: output, shape index: {}]  }
   0x1   :  { %19 = vsyncpa [#allocation5], 0  ;;  %s3689_s25 = smov [#allocation3]   ;;  %s3641_s29 = scalar_lea.hbm %s4623_s1, 16384 }
   0x2   :  { %s27_s26 = sshll.u32 %s3689_s25, 4  ;;  %p3642_p0 = scmp.ne.s32.totalorder %s4623_s1, %s3641_s29  ;;  %s28_s26 = int_to_ptr.vmem [resolvable:$true] %s27_s26 }
   0x3   :  { %p3645_p1 = scmp.lt.u32.totalorder %s3641_s29, %s4623_s1 }
   0x5   :  { %p3647_p2 = pnand %p3645_p1, %p3642_p0 }
   0x7   :  { %3650 = shalt.err (!%p3647_p2)
}
   0x8   :  { %s3651_s17 = scalar_lea.vmem %s28_s26, 16384  ;;  %p3656_p4 = scmp.lt.s32.totalorder %s28_s26, %s28_s26 }
   0x9   :  { %p3652_p3 = scmp.ne.s32.totalorder %s28_s26, %s3651_s17  ;;  %p3657_p5 = scmp.lt.s32.totalorder %s3651_s17, %s3651_s17 }
   0xb   :  { %p3658_p6 = por %p3657_p5, %p3656_p4 }
   0xd   :  { %p3659_p7 = pnand %p3658_p6, %p3652_p3 }
   0xf   :  { %3662 = shalt.err (!%p3659_p7)
}
  0x10   :  { %s3690_s18 = smov 256   ;;  %s3691_s19 = smov 16  }
  0x11   :  { %33 = dma.hbm_to_vmem [thread:$0]  %s4623_s1, 16384, %s28_s26, [#allocation4], %s3690_s18, %s3690_s18, %s3691_s19  }
  0x12   :  { %3685 = dma.done.wait [#allocation4], 16384  }
  0x13   :  { %3686 = vsyncadd [#allocation4], 4294950912  ;;  %v3347_v0 = vld [vmem:[#allocation3 + $0x4] ss:$16 sps:$4 sm:$0xff]   ;;  %v3349_v1 = vld [vmem:[#allocation3 + $0xc] ss:$16 sps:$4 sm:$0xff]   ;;  %v61_v36 = vlaneseq }
  0x14   :  { %853 = vmatprep.subr.bf16.mxu0 %v3347_v0  ;;  %v3351_v2 = vld [vmem:[#allocation3] ss:$16 sps:$4 sm:$0xff]   ;;  %v3352_v3 = vld [vmem:[#allocation3 + $0x8] ss:$16 sps:$4 sm:$0xff]   ;;  %935 = vmatprep.subr.bf16.mxu1 %v3349_v1  ;;  %v3353_v4 = vld [vmem:[#allocation3 + $0x24] ss:$16 sps:$4 sm:$0xff]  }
  0x15   :  { %854 = vmatpush1.bf16.msra.mxu0 %v3351_v2  ;;  %936 = vmatpush1.bf16.msra.mxu1 %v3352_v3  ;;  %v3355_v5 = vld [vmem:[#allocation3 + $0x2c] ss:$16 sps:$4 sm:$0xff]   ;;  %v3357_v6 = vld [vmem:[#allocation3 + $0x20] ss:$16 sps:$4 sm:$0xff]   ;;  %v3358_v7 = vld [vmem:[#allocation3 + $0x28] ss:$16 sps:$4 sm:$0xff]  }
  0x16   :  { %855 = vmatprep.subr.bf16.mxu0 %v3353_v4  ;;  %937 = vmatprep.subr.bf16.mxu1 %v3355_v5  ;;  %v3359_v8 = vld [vmem:[#allocation3 + $0x44] ss:$16 sps:$4 sm:$0xff]   ;;  %v3361_v9 = vld [vmem:[#allocation3 + $0x4c] ss:$16 sps:$4 sm:$0xff]   ;;  %v3363_v10 = vld [vmem:[#allocation3 + $0x40] ss:$16 sps:$4 sm:$0xff]  }
  0x17   :  { %v3364_v11 = vld [vmem:[#allocation3 + $0x48] ss:$16 sps:$4 sm:$0xff]   ;;  %v3365_v12 = vld [vmem:[#allocation3 + $0x64] ss:$16 sps:$4 sm:$0xff]   ;;  %v3367_v13 = vld [vmem:[#allocation3 + $0x6c] ss:$16 sps:$4 sm:$0xff]  }
  0x18   :  { %v3369_v14 = vld [vmem:[#allocation3 + $0x60] ss:$16 sps:$4 sm:$0xff]   ;;  %v3370_v15 = vld [vmem:[#allocation3 + $0x68] ss:$16 sps:$4 sm:$0xff]   ;;  %v3371_v16 = vld [vmem:[#allocation3 + $0x84] ss:$16 sps:$4 sm:$0xff]  }
  0x19   :  { %856 = vmatpush1.bf16.msra.mxu0 %v3357_v6  ;;  %938 = vmatpush1.bf16.msra.mxu1 %v3358_v7  ;;  %v3373_v17 = vld [vmem:[#allocation3 + $0x8c] ss:$16 sps:$4 sm:$0xff]   ;;  %v3375_v18 = vld [vmem:[#allocation3 + $0x80] ss:$16 sps:$4 sm:$0xff]   ;;  %v3376_v19 = vld [vmem:[#allocation3 + $0x88] ss:$16 sps:$4 sm:$0xff]  }
  0x1a   :  { %857 = vmatprep.subr.bf16.mxu0 %v3359_v8  ;;  %939 = vmatprep.subr.bf16.mxu1 %v3361_v9  ;;  %v3377_v20 = vld [vmem:[#allocation3 + $0xa4] ss:$16 sps:$4 sm:$0xff]   ;;  %v3379_v21 = vld [vmem:[#allocation3 + $0xac] ss:$16 sps:$4 sm:$0xff]   ;;  %v3381_v22 = vld [vmem:[#allocation3 + $0xa0] ss:$16 sps:$4 sm:$0xff]  }
  0x1b   :  { %v3382_v23 = vld [vmem:[#allocation3 + $0xa8] ss:$16 sps:$4 sm:$0xff]   ;;  %v3383_v24 = vld [vmem:[#allocation3 + $0xc4] ss:$16 sps:$4 sm:$0xff]   ;;  %v3385_v25 = vld [vmem:[#allocation3 + $0xcc] ss:$16 sps:$4 sm:$0xff]  }
  0x1c   :  { %v3387_v26 = vld [vmem:[#allocation3 + $0xc0] ss:$16 sps:$4 sm:$0xff]   ;;  %v3388_v27 = vld [vmem:[#allocation3 + $0xc8] ss:$16 sps:$4 sm:$0xff]   ;;  %v3389_v28 = vld [vmem:[#allocation3 + $0xe4] ss:$16 sps:$4 sm:$0xff]  }
  0x1d   :  { %858 = vmatpush1.bf16.msra.mxu0 %v3363_v10  ;;  %940 = vmatpush1.bf16.msra.mxu1 %v3364_v11  ;;  %v3391_v29 = vld [vmem:[#allocation3 + $0xec] ss:$16 sps:$4 sm:$0xff]   ;;  %v3393_v30 = vld [vmem:[#allocation3 + $0xe0] ss:$16 sps:$4 sm:$0xff]   ;;  %v3394_v31 = vld [vmem:[#allocation3 + $0xe8] ss:$16 sps:$4 sm:$0xff]  }
  0x1e   :  { %859 = vmatprep.subr.bf16.mxu0 %v3365_v12  ;;  %941 = vmatprep.subr.bf16.mxu1 %v3367_v13  ;;  %v3395_v32 = vld [vmem:[#allocation3 + $0x104] ss:$16 sps:$4 sm:$0xff]   ;;  %v3397_v33 = vld [vmem:[#allocation3 + $0x10c] ss:$16 sps:$4 sm:$0xff]   ;;  %v3399_v34 = vld [vmem:[#allocation3 + $0x100] ss:$16 sps:$4 sm:$0xff]  }
  0x1f   :  { %v3400_v35 = vld [vmem:[#allocation3 + $0x108] ss:$16 sps:$4 sm:$0xff]   ;;  %v3401_v37 = vld [vmem:[#allocation3 + $0x124] ss:$16 sps:$4 sm:$0xff]   ;;  %v3403_v38 = vld [vmem:[#allocation3 + $0x12c] ss:$16 sps:$4 sm:$0xff]  }
  0x20   :  { %v3405_v39 = vld [vmem:[#allocation3 + $0x120] ss:$16 sps:$4 sm:$0xff]   ;;  %v3778_v40 = vshrl.u32 %v61_v36, 7  ;;  %v3406_v41 = vld [vmem:[#allocation3 + $0x128] ss:$16 sps:$4 sm:$0xff]   ;;  %vm1231_vm0 = vcmask 1043456  }
  0x21   :  { %860 = vmatpush1.bf16.msra.mxu0 %v3369_v14  ;;  %942 = vmatpush1.bf16.msra.mxu1 %v3370_v15  ;;  %v3407_v42 = vld [vmem:[#allocation3 + $0x144] ss:$16 sps:$4 sm:$0xff]   ;;  %v3409_v43 = vld [vmem:[#allocation3 + $0x14c] ss:$16 sps:$4 sm:$0xff]   ;;  %v3411_v44 = vld [vmem:[#allocation3 + $0x140] ss:$16 sps:$4 sm:$0xff]  }
  0x22   :  { %861 = vmatprep.subr.bf16.mxu0 %v3371_v16  ;;  %943 = vmatprep.subr.bf16.mxu1 %v3373_v17  ;;  %v3412_v45 = vld [vmem:[#allocation3 + $0x148] ss:$16 sps:$4 sm:$0xff]   ;;  %v3781_v46 = vsub.s32 1, %v3778_v40  ;;  %v3413_v47 = vld [vmem:[#allocation3 + $0x164] ss:$16 sps:$4 sm:$0xff]   ;;  %v3791_v1 = vsub.s32 0, %v3778_v40 }
  0x23   :  { %v3415_v48 = vld [vmem:[#allocation3 + $0x16c] ss:$16 sps:$4 sm:$0xff]   ;;  %v3417_v50 = vld [vmem:[#allocation3 + $0x160] ss:$16 sps:$4 sm:$0xff]   ;;  %v3418_v52 = vld [vmem:[#allocation3 + $0x168] ss:$16 sps:$4 sm:$0xff]  }
  0x24   :  { %v3786_v49 = vld [vmem:[%s4622_s0] sm:$0xf]  ;;  %v3419_v53 = vld [vmem:[#allocation3 + $0x184] ss:$16 sps:$4 sm:$0xff]   ;;  %v3424_v57 = vld [vmem:[#allocation3 + $0x188] ss:$16 sps:$4 sm:$0xff]  }
  0x25   :  { %862 = vmatpush1.bf16.msra.mxu0 %v3375_v18  ;;  %944 = vmatpush1.bf16.msra.mxu1 %v3376_v19  ;;  %v68_v51 = vrot.slane %v3786_v49, %v3781_v46  ;;  %v3421_v54 = vld [vmem:[#allocation3 + $0x18c] ss:$16 sps:$4 sm:$0xff]   ;;  %v3423_v56 = vld [vmem:[#allocation3 + $0x180] ss:$16 sps:$4 sm:$0xff]   ;;  %v3425_v58 = vld [vmem:[#allocation3 + $0x1a4] ss:$16 sps:$4 sm:$0xff]   ;;  %v64_v7 = vrot.slane %v3786_v49, %v3791_v1 }
  0x26   :  { %863 = vmatprep.subr.bf16.mxu0 %v3377_v20  ;;  %945 = vmatprep.subr.bf16.mxu1 %v3379_v21  ;;  %v3427_v59 = vld [vmem:[#allocation3 + $0x1ac] ss:$16 sps:$4 sm:$0xff]   ;;  %v3429_v60 = vld [vmem:[#allocation3 + $0x1a0] ss:$16 sps:$4 sm:$0xff]   ;;  %v3430_v61 = vld [vmem:[#allocation3 + $0x1a8] ss:$16 sps:$4 sm:$0xff]  }
  0x27   :  { %v82_v55 = vpack.c.bf16 %v68_v51, %v68_v51  ;;  %v3431_v62 = vld [vmem:[#allocation3 + $0x1c4] ss:$16 sps:$4 sm:$0xff]   ;;  %v3433_v63 = vld [vmem:[#allocation3 + $0x1cc] ss:$16 sps:$4 sm:$0xff]   ;;  %v3435_v0 = vld [vmem:[#allocation3 + $0x1c0] ss:$16 sps:$4 sm:$0xff]   ;;  %v81_v13 = vpack.c.bf16 %v64_v7, %v64_v7 }
  0x28   :  { %v3436_v2 = vld [vmem:[#allocation3 + $0x1c8] ss:$16 sps:$4 sm:$0xff]   ;;  %v3437_v3 = vld [vmem:[#allocation3 + $0x1e4] ss:$16 sps:$4 sm:$0xff]   ;;  %v3439_v4 = vld [vmem:[#allocation3 + $0x1ec] ss:$16 sps:$4 sm:$0xff]  }
  0x29   :  { %864 = vmatpush1.bf16.msra.mxu0 %v3381_v22  ;;  %946 = vmatpush1.bf16.msra.mxu1 %v3382_v23  ;;  %v75_v5 = vsub.s32 3, %v3778_v40  ;;  %v3441_v6 = vld [vmem:[#allocation3 + $0x1e0] ss:$16 sps:$4 sm:$0xff]   ;;  %v3442_v8 = vld [vmem:[#allocation3 + $0x1e8] ss:$16 sps:$4 sm:$0xff]   ;;  %vm1227_vm1 = vcmask 31744  }
  0x2a   :  { %865 = vmatprep.subr.bf16.mxu0 %v3383_v24  ;;  %947 = vmatprep.subr.bf16.mxu1 %v3385_v25  ;;  %v3445_v9 = vld [vmem:[#allocation3 + $0x204] ss:$16 sps:$4 sm:$0xff]   ;;  %v3448_v10 = vld [vmem:[#allocation3 + $0x20c] ss:$16 sps:$4 sm:$0xff]   ;;  %v3443_v12 = vld [vmem:[#allocation3 + $0x200] ss:$16 sps:$4 sm:$0xff]  }
  0x2b   :  { %885 = vmatprep.mubr.bf16.mxu0 %v82_v55  ;;  %967 = vmatprep.mubr.bf16.mxu1 %v82_v55  ;;  %v76_v11 = vrot.slane %v3786_v49, %v75_v5  ;;  %v3446_v14 = vld [vmem:[#allocation3 + $0x208] ss:$16 sps:$4 sm:$0xff]   ;;  %v3451_v15 = vld [vmem:[#allocation3 + $0x224] ss:$16 sps:$4 sm:$0xff]   ;;  %v3454_v16 = vld [vmem:[#allocation3 + $0x22c] ss:$16 sps:$4 sm:$0xff]  }
  0x2c   :  { %v3449_v18 = vld [vmem:[#allocation3 + $0x220] ss:$16 sps:$4 sm:$0xff]   ;;  %v3452_v19 = vld [vmem:[#allocation3 + $0x228] ss:$16 sps:$4 sm:$0xff]   ;;  %v3457_v20 = vld [vmem:[#allocation3 + $0x244] ss:$16 sps:$4 sm:$0xff]  }
  0x2d   :  { %866 = vmatpush1.bf16.msra.mxu0 %v3387_v26  ;;  %948 = vmatpush1.bf16.msra.mxu1 %v3388_v27  ;;  %v84_v17 = vpack.c.bf16 %v76_v11, %v76_v11  ;;  %v3460_v21 = vld [vmem:[#allocation3 + $0x24c] ss:$16 sps:$4 sm:$0xff]   ;;  %v3455_v22 = vld [vmem:[#allocation3 + $0x240] ss:$16 sps:$4 sm:$0xff]   ;;  %v3458_v23 = vld [vmem:[#allocation3 + $0x248] ss:$16 sps:$4 sm:$0xff]  }
  0x2e   :  { %867 = vmatprep.subr.bf16.mxu0 %v3389_v28  ;;  %949 = vmatprep.subr.bf16.mxu1 %v3391_v29  ;;  %v3463_v24 = vld [vmem:[#allocation3 + $0x264] ss:$16 sps:$4 sm:$0xff]   ;;  %v3466_v25 = vld [vmem:[#allocation3 + $0x26c] ss:$16 sps:$4 sm:$0xff]   ;;  %v3461_v26 = vld [vmem:[#allocation3 + $0x260] ss:$16 sps:$4 sm:$0xff]  }
  0x2f   :  { %v3464_v27 = vld [vmem:[#allocation3 + $0x268] ss:$16 sps:$4 sm:$0xff]   ;;  %v3469_v28 = vld [vmem:[#allocation3 + $0x284] ss:$16 sps:$4 sm:$0xff]   ;;  %v3472_v29 = vld [vmem:[#allocation3 + $0x28c] ss:$16 sps:$4 sm:$0xff]  }
  0x30   :  { %v3481_v36 = vld [vmem:[#allocation3 + $0x2c4] ss:$16 sps:$4 sm:$0xff]   ;;  %v3521_v7 = vld [vmem:[#allocation3 + $0x3a0] ss:$16 sps:$4 sm:$0xff]   ;;  %vm2286_vm2 = vcmask 64512   ;;  %vm3694_vm3 = vmmov 0  }
  0x31   :  { %868 = vmatpush1.bf16.msra.mxu0 %v3393_v30  ;;  %950 = vmatpush1.bf16.msra.mxu1 %v3394_v31  ;;  %v3467_v30 = vld [vmem:[#allocation3 + $0x280] ss:$16 sps:$4 sm:$0xff]   ;;  %v3470_v31 = vld [vmem:[#allocation3 + $0x288] ss:$16 sps:$4 sm:$0xff]   ;;  %v3499_v51 = vld [vmem:[#allocation3 + $0x324] ss:$16 sps:$4 sm:$0xff]  }
  0x32   :  { %869 = vmatprep.subr.bf16.mxu0 %v3395_v32  ;;  %951 = vmatprep.subr.bf16.mxu1 %v3397_v33  ;;  %v3475_v32 = vld [vmem:[#allocation3 + $0x2a4] ss:$16 sps:$4 sm:$0xff]   ;;  %v3478_v33 = vld [vmem:[#allocation3 + $0x2ac] ss:$16 sps:$4 sm:$0xff]   ;;  %v3527_v11 = vld [vmem:[#allocation3 + $0x3c0] ss:$16 sps:$4 sm:$0xff]  }
  0x33   :  { %v3505_v55 = vld [vmem:[#allocation3 + $0x344] ss:$16 sps:$4 sm:$0xff]   ;;  %s3695_s25 = smov [#allocation6]   ;;  %vm2626_vm4 = vcmask 123904  }
  0x34   :  { %s2634_s26 = sshll.u32 %s3695_s25, 4  ;;  %s2635_s26 = int_to_ptr.vmem [resolvable:$true] %s2634_s26 }
  0x35   :  { %870 = vmatpush1.bf16.msra.mxu0 %v3399_v34  ;;  %952 = vmatpush1.bf16.msra.mxu1 %v3400_v35  ;;  %v3473_v34 = vld [vmem:[#allocation3 + $0x2a0] ss:$16 sps:$4 sm:$0xff]   ;;  %v3476_v35 = vld [vmem:[#allocation3 + $0x2a8] ss:$16 sps:$4 sm:$0xff]   ;;  %s3663_s27 = scalar_lea.vmem %s2635_s26, 32  ;;  %p3668_p9 = scmp.lt.s32.totalorder %s2635_s26, %s2635_s26 }
  0x36   :  { %871 = vmatprep.subr.bf16.mxu0 %v3401_v37  ;;  %953 = vmatprep.subr.bf16.mxu1 %v3403_v38  ;;  %v3484_v37 = vld [vmem:[#allocation3 + $0x2cc] ss:$16 sps:$4 sm:$0xff]   ;;  %v3479_v38 = vld [vmem:[#allocation3 + $0x2c0] ss:$16 sps:$4 sm:$0xff]   ;;  %p3664_p8 = scmp.ne.s32.totalorder %s2635_s26, %s3663_s27  ;;  %p3669_p10 = scmp.lt.s32.totalorder %s3663_s27, %s3663_s27 }
  0x38   :  { %p3670_p11 = por %p3669_p10, %p3668_p9 }
  0x39   :  { %872 = vmatpush1.bf16.msra.mxu0 %v3405_v39  ;;  %954 = vmatpush1.bf16.msra.mxu1 %v3406_v41  ;;  %v3482_v39 = vld [vmem:[#allocation3 + $0x2c8] ss:$16 sps:$4 sm:$0xff]   ;;  %v3487_v41 = vld [vmem:[#allocation3 + $0x2e4] ss:$16 sps:$4 sm:$0xff]  }
  0x3a   :  { %873 = vmatprep.subr.bf16.mxu0 %v3407_v42  ;;  %955 = vmatprep.subr.bf16.mxu1 %v3409_v43  ;;  %v3490_v42 = vld [vmem:[#allocation3 + $0x2ec] ss:$16 sps:$4 sm:$0xff]   ;;  %v3485_v43 = vld [vmem:[#allocation3 + $0x2e0] ss:$16 sps:$4 sm:$0xff]   ;;  %p3671_p12 = pnand %p3670_p11, %p3664_p8 }
  0x3d   :  { %874 = vmatpush1.bf16.msra.mxu0 %v3411_v44  ;;  %956 = vmatpush1.bf16.msra.mxu1 %v3412_v45  ;;  %v3488_v44 = vld [vmem:[#allocation3 + $0x2e8] ss:$16 sps:$4 sm:$0xff]   ;;  %v3493_v45 = vld [vmem:[#allocation3 + $0x304] ss:$16 sps:$4 sm:$0xff]  }
  0x3e   :  { %875 = vmatprep.subr.bf16.mxu0 %v3413_v47  ;;  %957 = vmatprep.subr.bf16.mxu1 %v3415_v48  ;;  %v3496_v47 = vld [vmem:[#allocation3 + $0x30c] ss:$16 sps:$4 sm:$0xff]   ;;  %v3491_v48 = vld [vmem:[#allocation3 + $0x300] ss:$16 sps:$4 sm:$0xff]  }
  0x41   :  { %876 = vmatpush1.bf16.msra.mxu0 %v3417_v50  ;;  %958 = vmatpush1.bf16.msra.mxu1 %v3418_v52  ;;  %v3494_v50 = vld [vmem:[#allocation3 + $0x308] ss:$16 sps:$4 sm:$0xff]   ;;  %v3502_v52 = vld [vmem:[#allocation3 + $0x32c] ss:$16 sps:$4 sm:$0xff]  }
  0x42   :  { %877 = vmatprep.subr.bf16.mxu0 %v3419_v53  ;;  %959 = vmatprep.subr.bf16.mxu1 %v3421_v54  ;;  %v3497_v53 = vld [vmem:[#allocation3 + $0x320] ss:$16 sps:$4 sm:$0xff]   ;;  %v3500_v54 = vld [vmem:[#allocation3 + $0x328] ss:$16 sps:$4 sm:$0xff]  }
  0x45   :  { %878 = vmatpush1.bf16.msra.mxu0 %v3423_v56  ;;  %960 = vmatpush1.bf16.msra.mxu1 %v3424_v57  ;;  %v3508_v56 = vld [vmem:[#allocation3 + $0x34c] ss:$16 sps:$4 sm:$0xff]   ;;  %v3503_v57 = vld [vmem:[#allocation3 + $0x340] ss:$16 sps:$4 sm:$0xff]  }
  0x46   :  { %879 = vmatprep.subr.bf16.mxu0 %v3425_v58  ;;  %961 = vmatprep.subr.bf16.mxu1 %v3427_v59  ;;  %v3506_v58 = vld [vmem:[#allocation3 + $0x348] ss:$16 sps:$4 sm:$0xff]   ;;  %v3511_v59 = vld [vmem:[#allocation3 + $0x364] ss:$16 sps:$4 sm:$0xff]  }
  0x49   :  { %880 = vmatpush1.bf16.msra.mxu0 %v3429_v60  ;;  %962 = vmatpush1.bf16.msra.mxu1 %v3430_v61  ;;  %v3514_v60 = vld [vmem:[#allocation3 + $0x36c] ss:$16 sps:$4 sm:$0xff]   ;;  %v3509_v61 = vld [vmem:[#allocation3 + $0x360] ss:$16 sps:$4 sm:$0xff]  }
  0x4a   :  { %881 = vmatprep.subr.bf16.mxu0 %v3431_v62  ;;  %963 = vmatprep.subr.bf16.mxu1 %v3433_v63  ;;  %v3512_v62 = vld [vmem:[#allocation3 + $0x368] ss:$16 sps:$4 sm:$0xff]   ;;  %v3517_v63 = vld [vmem:[#allocation3 + $0x384] ss:$16 sps:$4 sm:$0xff]  }
  0x4d   :  { %882 = vmatpush1.bf16.msra.mxu0 %v3435_v0  ;;  %964 = vmatpush1.bf16.msra.mxu1 %v3436_v2  ;;  %v3520_v0 = vld [vmem:[#allocation3 + $0x38c] ss:$16 sps:$4 sm:$0xff]   ;;  %v3515_v2 = vld [vmem:[#allocation3 + $0x380] ss:$16 sps:$4 sm:$0xff]  }
  0x4e   :  { %883 = vmatprep.subr.bf16.mxu0 %v3437_v3  ;;  %965 = vmatprep.subr.bf16.mxu1 %v3439_v4  ;;  %v3518_v3 = vld [vmem:[#allocation3 + $0x388] ss:$16 sps:$4 sm:$0xff]   ;;  %v3523_v4 = vld [vmem:[#allocation3 + $0x3a4] ss:$16 sps:$4 sm:$0xff]  }
  0x51   :  { %884 = vmatpush1.bf16.msra.mxu0 %v3441_v6  ;;  %966 = vmatpush1.bf16.msra.mxu1 %v3442_v8  ;;  %v3526_v6 = vld [vmem:[#allocation3 + $0x3ac] ss:$16 sps:$4 sm:$0xff]   ;;  %v3524_v8 = vld [vmem:[#allocation3 + $0x3a8] ss:$16 sps:$4 sm:$0xff]  }
  0x52   :  { %894 = vmatprep.subr.bf16.mxu0 %v3445_v9  ;;  %976 = vmatprep.subr.bf16.mxu1 %v3448_v10  ;;  %v3529_v9 = vld [vmem:[#allocation3 + $0x3c4] ss:$16 sps:$4 sm:$0xff]   ;;  %v3532_v10 = vld [vmem:[#allocation3 + $0x3cc] ss:$16 sps:$4 sm:$0xff]  }
  0x54   :  { %886 = vmatmul.mubr.bf16.vlgmr.msra.gmra.mrb[0].mxu0 %v81_v13  ;;  %968 = vmatmul.mubr.bf16.vlgmr.msra.gmra.mrb[0].mxu1 %v81_v13  ;;  %v3535_v13 = vld [vmem:[#allocation3 + $0x3e4] ss:$16 sps:$4 sm:$0xff]  }
  0x55   :  { %895 = vmatpush1.bf16.msra.mxu0 %v3443_v12  ;;  %977 = vmatpush1.bf16.msra.mxu1 %v3446_v14  ;;  %v3530_v12 = vld [vmem:[#allocation3 + $0x3c8] ss:$16 sps:$4 sm:$0xff]   ;;  %v3538_v14 = vld [vmem:[#allocation3 + $0x3ec] ss:$16 sps:$4 sm:$0xff]  }
  0x56   :  { %896 = vmatprep.subr.bf16.mxu0 %v3451_v15  ;;  %978 = vmatprep.subr.bf16.mxu1 %v3454_v16  ;;  %v71_v15 = vsub.s32 2, %v3778_v40  ;;  %v1033_v16 = vld [vmem:[%s4624_s2 + $0x80] sm:$0xff]  ;;  %v3594_v40 = vld [vmem:[%s4628_s6 + $0x114] ss:$8 sps:$4 sm:$0xff]  }
  0x57   :  { %926 = vmatprep.mubr.bf16.mxu0 %v84_v17  ;;  %1008 = vmatprep.mubr.bf16.mxu1 %v84_v17  ;;  %v1034_v17 = vld [vmem:[%s4624_s2 + $0x88] sm:$0xff] }
  0x59   :  { %897 = vmatpush1.bf16.msra.mxu0 %v3449_v18  ;;  %979 = vmatpush1.bf16.msra.mxu1 %v3452_v19  ;;  %v1065_v18 = vld [vmem:[%s4624_s2 + $0x180] sm:$0xff]  ;;  %v1066_v19 = vld [vmem:[%s4624_s2 + $0x188] sm:$0xff] }
  0x5a   :  { %898 = vmatprep.subr.bf16.mxu0 %v3457_v20  ;;  %980 = vmatprep.subr.bf16.mxu1 %v3460_v21  ;;  %v3533_v20 = vld [vmem:[#allocation3 + $0x3e0] ss:$16 sps:$4 sm:$0xff]   ;;  %v3536_v21 = vld [vmem:[#allocation3 + $0x3e8] ss:$16 sps:$4 sm:$0xff]  }
  0x5d   :  { %899 = vmatpush1.bf16.msra.mxu0 %v3455_v22  ;;  %981 = vmatpush1.bf16.msra.mxu1 %v3458_v23  ;;  %v72_v22 = vrot.slane %v3786_v49, %v71_v15  ;;  %v1017_v23 = vld [vmem:[%s4624_s2] sm:$0xff]  ;;  %v1035_v49 = vld [vmem:[%s4624_s2 + $0x90] sm:$0xff] }
  0x5e   :  { %900 = vmatprep.subr.bf16.mxu0 %v3463_v24  ;;  %982 = vmatprep.subr.bf16.mxu1 %v3466_v25  ;;  %v1018_v24 = vld [vmem:[%s4624_s2 + $0x8] sm:$0xff]  ;;  %v1049_v25 = vld [vmem:[%s4624_s2 + $0x100] sm:$0xff] }
  0x61   :  { %901 = vmatpush1.bf16.msra.mxu0 %v3461_v26  ;;  %983 = vmatpush1.bf16.msra.mxu1 %v3464_v27  ;;  %v1050_v26 = vld [vmem:[%s4624_s2 + $0x108] sm:$0xff]  ;;  %v1036_v27 = vld [vmem:[%s4624_s2 + $0x98] sm:$0xff] }
  0x62   :  { %902 = vmatprep.subr.bf16.mxu0 %v3469_v28  ;;  %984 = vmatprep.subr.bf16.mxu1 %v3472_v29  ;;  %v1067_v28 = vld [vmem:[%s4624_s2 + $0x190] sm:$0xff]  ;;  %v1068_v29 = vld [vmem:[%s4624_s2 + $0x198] sm:$0xff] }
  0x65   :  { %903 = vmatpush1.bf16.msra.mxu0 %v3467_v30  ;;  %985 = vmatpush1.bf16.msra.mxu1 %v3470_v31  ;;  %v3839_v30 = vpack.c.bf16 %v1034_v17, %v1033_v16  ;;  %v3841_v31 = vpack.c.bf16 %v1066_v19, %v1065_v18  ;;  %v1057_v17 = vld [vmem:[%s4624_s2 + $0x140] sm:$0xff]  ;;  %v1058_v18 = vld [vmem:[%s4624_s2 + $0x148] sm:$0xff]  ;;  %v1043_v19 = vld [vmem:[%s4624_s2 + $0xd0] sm:$0xff] }
  0x66   :  { %904 = vmatprep.subr.bf16.mxu0 %v3475_v32  ;;  %986 = vmatprep.subr.bf16.mxu1 %v3478_v33  ;;  %v83_v32 = vpack.c.bf16 %v72_v22, %v72_v22  ;;  %v3843_v33 = vpack.c.bf16 %v1018_v24, %v1017_v23  ;;  %v1076_v22 = vld [vmem:[%s4624_s2 + $0x1d8] sm:$0xff]  ;;  %v3989_v24 = vpack.c.bf16 %v1058_v18, %v1057_v17 }
  0x69   :  { %905 = vmatpush1.bf16.msra.mxu0 %v3473_v34  ;;  %987 = vmatpush1.bf16.msra.mxu1 %v3476_v35  ;;  %v3845_v34 = vpack.c.bf16 %v1050_v26, %v1049_v25  ;;  %v1019_v35 = vld [vmem:[%s4624_s2 + $0x10] sm:$0xff]  ;;  %v1028_v26 = vld [vmem:[%s4624_s2 + $0x58] sm:$0xff] }
  0x6a   :  { %906 = vmatprep.subr.bf16.mxu0 %v3481_v36  ;;  %988 = vmatprep.subr.bf16.mxu1 %v3484_v37  ;;  %v1020_v36 = vld [vmem:[%s4624_s2 + $0x18] sm:$0xff]  ;;  %v3855_v37 = vpack.c.bf16 %v1036_v27, %v1035_v49  ;;  %v1027_v25 = vld [vmem:[%s4624_s2 + $0x50] sm:$0xff] }
  0x6d   :  { %907 = vmatpush1.bf16.msra.mxu0 %v3479_v38  ;;  %989 = vmatpush1.bf16.msra.mxu1 %v3482_v39  ;;  %v3857_v38 = vpack.c.bf16 %v1068_v29, %v1067_v28  ;;  %v1051_v39 = vld [vmem:[%s4624_s2 + $0x110] sm:$0xff]  ;;  %v1060_v29 = vld [vmem:[%s4624_s2 + $0x158] sm:$0xff] }
  0x6e   :  { %908 = vmatprep.subr.bf16.mxu0 %v3487_v41  ;;  %990 = vmatprep.subr.bf16.mxu1 %v3490_v42  ;;  %v1052_v41 = vld [vmem:[%s4624_s2 + $0x118] sm:$0xff]  ;;  %v1037_v42 = vld [vmem:[%s4624_s2 + $0xa0] sm:$0xff]  ;;  %v1059_v28 = vld [vmem:[%s4624_s2 + $0x150] sm:$0xff] }
  0x71   :  { %909 = vmatpush1.bf16.msra.mxu0 %v3485_v43  ;;  %991 = vmatpush1.bf16.msra.mxu1 %v3488_v44  ;;  %v1038_v43 = vld [vmem:[%s4624_s2 + $0xa8] sm:$0xff]  ;;  %v1069_v44 = vld [vmem:[%s4624_s2 + $0x1a0] sm:$0xff] }
  0x72   :  { %910 = vmatprep.subr.bf16.mxu0 %v3493_v45  ;;  %992 = vmatprep.subr.bf16.mxu1 %v3496_v47  ;;  %v1070_v45 = vld [vmem:[%s4624_s2 + $0x1a8] sm:$0xff]  ;;  %v3879_v47 = vpack.c.bf16 %v1020_v36, %v1019_v35  ;;  %v1077_v36 = vld [vmem:[%s4624_s2 + $0x1e0] sm:$0xff] }
  0x73   :  { %v1046_v35 = vld [vmem:[%s4624_s2 + $0xe8] sm:$0xff] }
  0x75   :  { %911 = vmatpush1.bf16.msra.mxu0 %v3491_v48  ;;  %993 = vmatpush1.bf16.msra.mxu1 %v3494_v50  ;;  %v3881_v48 = vpack.c.bf16 %v1052_v41, %v1051_v39  ;;  %v1021_v50 = vld [vmem:[%s4624_s2 + $0x20] sm:$0xff]  ;;  %v1078_v39 = vld [vmem:[%s4624_s2 + $0x1e8] sm:$0xff]  ;;  %v3134_v41 = vpack.c.bf16 %v1028_v26, %v1027_v25 }
  0x76   :  { %912 = vmatprep.subr.bf16.mxu0 %v3499_v51  ;;  %994 = vmatprep.subr.bf16.mxu1 %v3502_v52  ;;  %v1022_v51 = vld [vmem:[%s4624_s2 + $0x28] sm:$0xff]  ;;  %v3891_v52 = vpack.c.bf16 %v1038_v43, %v1037_v42  ;;  %v4023_v42 = vpack.c.bf16 %v1060_v29, %v1059_v28  ;;  %v1029_v43 = vld [vmem:[%s4624_s2 + $0x60] sm:$0xff] }
  0x77   :  { %v3541_v29 = vld [vmem:[%s4628_s6] ss:$8 sps:$4 sm:$0xff]  }
  0x79   :  { %913 = vmatpush1.bf16.msra.mxu0 %v3497_v53  ;;  %995 = vmatpush1.bf16.msra.mxu1 %v3500_v54  ;;  %v3893_v53 = vpack.c.bf16 %v1070_v45, %v1069_v44  ;;  %v1053_v54 = vld [vmem:[%s4624_s2 + $0x120] sm:$0xff]  ;;  %v1030_v44 = vld [vmem:[%s4624_s2 + $0x68] sm:$0xff] }
  0x7a   :  { %914 = vmatprep.subr.bf16.mxu0 %v3505_v55  ;;  %996 = vmatprep.subr.bf16.mxu1 %v3508_v56  ;;  %v1054_v55 = vld [vmem:[%s4624_s2 + $0x128] sm:$0xff]  ;;  %v1039_v56 = vld [vmem:[%s4624_s2 + $0xb0] sm:$0xff] }
  0x7d   :  { %915 = vmatpush1.bf16.msra.mxu0 %v3503_v57  ;;  %997 = vmatpush1.bf16.msra.mxu1 %v3506_v58  ;;  %v1040_v57 = vld [vmem:[%s4624_s2 + $0xb8] sm:$0xff]  ;;  %v1071_v58 = vld [vmem:[%s4624_s2 + $0x1b0] sm:$0xff] }
  0x7e   :  { %916 = vmatprep.subr.bf16.mxu0 %v3511_v59  ;;  %998 = vmatprep.subr.bf16.mxu1 %v3514_v60  ;;  %v1072_v59 = vld [vmem:[%s4624_s2 + $0x1b8] sm:$0xff]  ;;  %v3915_v60 = vpack.c.bf16 %v1022_v51, %v1021_v50  ;;  %v4033_v50 = vpack.c.bf16 %v1078_v39, %v1077_v36  ;;  %v1061_v51 = vld [vmem:[%s4624_s2 + $0x160] sm:$0xff] }
  0x7f   :  { %v3544_v36 = vld [vmem:[%s4628_s6 + $0x10] ss:$8 sps:$4 sm:$0xff]   ;;  %v3549_v39 = vld [vmem:[%s4628_s6 + $0x24] ss:$8 sps:$4 sm:$0xff]  }
  0x81   :  { %917 = vmatpush1.bf16.msra.mxu0 %v3509_v61  ;;  %999 = vmatpush1.bf16.msra.mxu1 %v3512_v62  ;;  %v3917_v61 = vpack.c.bf16 %v1054_v55, %v1053_v54  ;;  %v1023_v62 = vld [vmem:[%s4624_s2 + $0x30] sm:$0xff]  ;;  %v1062_v54 = vld [vmem:[%s4624_s2 + $0x168] sm:$0xff] }
  0x82   :  { %918 = vmatprep.subr.bf16.mxu0 %v3517_v63  ;;  %1000 = vmatprep.subr.bf16.mxu1 %v3520_v0  ;;  %v1024_v63 = vld [vmem:[%s4624_s2 + $0x38] sm:$0xff]  ;;  %v3927_v0 = vpack.c.bf16 %v1040_v57, %v1039_v56  ;;  %v1047_v55 = vld [vmem:[%s4624_s2 + $0xf0] sm:$0xff] }
  0x83   :  { %v1048_v56 = vld [vmem:[%s4624_s2 + $0xf8] sm:$0xff]  ;;  %v1079_v57 = vld [vmem:[%s4624_s2 + $0x1f0] sm:$0xff] }
  0x85   :  { %919 = vmatpush1.bf16.msra.mxu0 %v3515_v2  ;;  %1001 = vmatpush1.bf16.msra.mxu1 %v3518_v3  ;;  %v3929_v2 = vpack.c.bf16 %v1072_v59, %v1071_v58  ;;  %v1055_v3 = vld [vmem:[%s4624_s2 + $0x130] sm:$0xff]  ;;  %v1080_v58 = vld [vmem:[%s4624_s2 + $0x1f8] sm:$0xff]  ;;  %v3138_v59 = vpack.c.bf16 %v1030_v44, %v1029_v43  ;;  %v3555_v44 = vld [vmem:[%s4628_s6 + $0x44] ss:$8 sps:$4 sm:$0xff]  }
  0x86   :  { %920 = vmatprep.subr.bf16.mxu0 %v3523_v4  ;;  %1002 = vmatprep.subr.bf16.mxu1 %v3526_v6  ;;  %v1056_v4 = vld [vmem:[%s4624_s2 + $0x138] sm:$0xff]  ;;  %v1041_v6 = vld [vmem:[%s4624_s2 + $0xc0] sm:$0xff] }
  0x87   :  { %v3550_v43 = vld [vmem:[%s4628_s6 + $0x30] ss:$8 sps:$4 sm:$0xff]  }
  0x89   :  { %921 = vmatpush1.bf16.msra.mxu0 %v3521_v7  ;;  %1003 = vmatpush1.bf16.msra.mxu1 %v3524_v8  ;;  %v1042_v7 = vld [vmem:[%s4624_s2 + $0xc8] sm:$0xff]  ;;  %v1073_v8 = vld [vmem:[%s4624_s2 + $0x1c0] sm:$0xff] }
  0x8a   :  { %922 = vmatprep.subr.bf16.mxu0 %v3529_v9  ;;  %1004 = vmatprep.subr.bf16.mxu1 %v3532_v10  ;;  %v1074_v9 = vld [vmem:[%s4624_s2 + $0x1c8] sm:$0xff]  ;;  %v3951_v10 = vpack.c.bf16 %v1024_v63, %v1023_v62  ;;  %v4054_v62 = vpack.c.bf16 %v1062_v54, %v1061_v51  ;;  %v3140_v63 = vpack.c.bf16 %v1048_v56, %v1047_v55  ;;  %v3556_v51 = vld [vmem:[%s4628_s6 + $0x50] ss:$8 sps:$4 sm:$0xff]   ;;  %v3564_v56 = vld [vmem:[%s4628_s6 + $0x74] ss:$8 sps:$4 sm:$0xff]  }
  0x8b   :  { %v3965_v16 = vpack.c.bf16 %v1074_v9, %v1073_v8  ;;  %v1064_v9 = vld [vmem:[%s4624_s2 + $0x178] sm:$0xff]  ;;  %v3561_v54 = vld [vmem:[%s4628_s6 + $0x64] ss:$8 sps:$4 sm:$0xff]   ;;  %v3559_v55 = vld [vmem:[%s4628_s6 + $0x60] ss:$8 sps:$4 sm:$0xff]  }
  0x8d   :  { %923 = vmatpush1.bf16.msra.mxu0 %v3527_v11  ;;  %1005 = vmatpush1.bf16.msra.mxu1 %v3530_v12  ;;  %v3953_v11 = vpack.c.bf16 %v1056_v4, %v1055_v3  ;;  %v1025_v12 = vld [vmem:[%s4624_s2 + $0x40] sm:$0xff]  ;;  %v4057_v3 = vpack.c.bf16 %v1080_v58, %v1079_v57  ;;  %v1031_v4 = vld [vmem:[%s4624_s2 + $0x70] sm:$0xff] }
  0x8e   :  { %924 = vmatprep.subr.bf16.mxu0 %v3535_v13  ;;  %1006 = vmatprep.subr.bf16.mxu1 %v3538_v14  ;;  %v1026_v13 = vld [vmem:[%s4624_s2 + $0x48] sm:$0xff]  ;;  %v3963_v14 = vpack.c.bf16 %v1042_v7, %v1041_v6  ;;  %v1032_v6 = vld [vmem:[%s4624_s2 + $0x78] sm:$0xff]  ;;  %v1063_v7 = vld [vmem:[%s4624_s2 + $0x170] sm:$0xff] }
  0x8f   :  { %v3987_v23 = vpack.c.bf16 %v1026_v13, %v1025_v12  ;;  %v3142_v8 = vpack.c.bf16 %v1032_v6, %v1031_v4  ;;  %v4073_v12 = vpack.c.bf16 %v1064_v9, %v1063_v7  ;;  %v3562_v57 = vld [vmem:[%s4628_s6 + $0x70] ss:$8 sps:$4 sm:$0xff]   ;;  %v3567_v58 = vld [vmem:[%s4628_s6 + $0x84] ss:$8 sps:$4 sm:$0xff]   ;;  %v3571_v4 = vld [vmem:[%s4628_s6 + $0xa0] ss:$8 sps:$4 sm:$0xff]  }
  0x90   :  { %v3576_v6 = vld [vmem:[%s4628_s6 + $0xb4] ss:$8 sps:$4 sm:$0xff]   ;;  %v3574_v7 = vld [vmem:[%s4628_s6 + $0xb0] ss:$8 sps:$4 sm:$0xff]   ;;  %v3577_v9 = vld [vmem:[%s4628_s6 + $0xc0] ss:$8 sps:$4 sm:$0xff]  }
  0x91   :  { %925 = vmatpush1.bf16.msra.mxu0 %v3533_v20  ;;  %1007 = vmatpush1.bf16.msra.mxu1 %v3536_v21  ;;  %v1044_v20 = vld [vmem:[%s4624_s2 + $0xd8] sm:$0xff]  ;;  %v1075_v21 = vld [vmem:[%s4624_s2 + $0x1d0] sm:$0xff] }
  0x92   :  { %3113 = vmatprep.subr.bf16.mxu0 %v3839_v30  ;;  %3145 = vmatprep.subr.bf16.mxu1 %v3841_v31  ;;  %v3999_v49 = vpack.c.bf16 %v1044_v20, %v1043_v19  ;;  %v4001_v27 = vpack.c.bf16 %v1076_v22, %v1075_v21 }
  0x94   :  { %927 = vmatmul.mubr.bf16.vlgmr.msra.gmra.mrb[0].mxu0 %v83_v32  ;;  %1009 = vmatmul.mubr.bf16.vlgmr.msra.gmra.mrb[0].mxu1 %v83_v32  ;;  %v1045_v32 = vld [vmem:[%s4624_s2 + $0xe0] sm:$0xff] }
  0x95   :  { %3115 = vmatpush3.bf16.msra.mxu0 %v3843_v33  ;;  %3147 = vmatpush3.bf16.msra.mxu1 %v3845_v34  ;;  %v3136_v45 = vpack.c.bf16 %v1046_v35, %v1045_v32  ;;  %v3543_v32 = vld [vmem:[%s4628_s6 + $0x4] ss:$8 sps:$4 sm:$0xff]   ;;  %v3546_v35 = vld [vmem:[%s4628_s6 + $0x14] ss:$8 sps:$4 sm:$0xff]  }
  0x96   :  { %3117 = vmatprep.subr.bf16.mxu0 %v3855_v37  ;;  %3149 = vmatprep.subr.bf16.mxu1 %v3857_v38 }
  0x99   :  { %3119 = vmatpush3.bf16.msra.mxu0 %v3879_v47  ;;  %3151 = vmatpush3.bf16.msra.mxu1 %v3881_v48 }
  0x9a   :  { %3121 = vmatprep.subr.bf16.mxu0 %v3891_v52  ;;  %3153 = vmatprep.subr.bf16.mxu1 %v3893_v53 }
  0x9d   :  { %3123 = vmatpush3.bf16.msra.mxu0 %v3915_v60  ;;  %3155 = vmatpush3.bf16.msra.mxu1 %v3917_v61 }
  0x9e   :  { %3125 = vmatprep.subr.bf16.mxu0 %v3927_v0  ;;  %3157 = vmatprep.subr.bf16.mxu1 %v3929_v2 }
  0xa1   :  { %3127 = vmatpush3.bf16.msra.mxu0 %v3951_v10  ;;  %3159 = vmatpush3.bf16.msra.mxu1 %v3953_v11 }
  0xa2   :  { %3129 = vmatprep.subr.bf16.mxu0 %v3963_v14  ;;  %3161 = vmatprep.subr.bf16.mxu1 %v3965_v16 }
  0xa5   :  { %3131 = vmatpush3.bf16.msra.mxu0 %v3987_v23  ;;  %3163 = vmatpush3.bf16.msra.mxu1 %v3989_v24 }
  0xa6   :  { %3133 = vmatprep.subr.bf16.mxu0 %v3999_v49  ;;  %3165 = vmatprep.subr.bf16.mxu1 %v4001_v27 }
  0xa9   :  { %3135 = vmatpush3.bf16.msra.mxu0 %v3134_v41  ;;  %3167 = vmatpush3.bf16.msra.mxu1 %v4023_v42 }
  0xaa   :  { %3137 = vmatprep.subr.bf16.mxu0 %v3136_v45  ;;  %3169 = vmatprep.subr.bf16.mxu1 %v4033_v50 }
  0xad   :  { %3139 = vmatpush3.bf16.msra.mxu0 %v3138_v59  ;;  %3171 = vmatpush3.bf16.msra.mxu1 %v4054_v62 }
  0xae   :  { %3141 = vmatprep.subr.bf16.mxu0 %v3140_v63  ;;  %3173 = vmatprep.subr.bf16.mxu1 %v4057_v3 }
  0xb1   :  { %3143 = vmatpush3.bf16.msra.mxu0 %v3142_v8  ;;  %3175 = vmatpush3.bf16.msra.mxu1 %v4073_v12 }
  0xb2   :  { %3177 = vmatprep.subr.bf16.mxu0 %v3839_v30  ;;  %v1081_v30 = vld [vmem:[%s4625_s3] sm:$0xff] }
 0x167   :  { %v4077_v13 = vpop.f32.mrb[0].mxu0  ;;  %v4079_v17 = vpop.f32.mrb[0].mxu1 }
 0x168   :  { %v4081_v18 = vpop.f32.mrb[1].mxu0  ;;  %v4083_v19 = vpop.f32.mrb[1].mxu1 }
 0x169   :  { %v932_v20 = vpop.f32.mrb[2].mxu0  ;;  %v1014_v21 = vpop.f32.mrb[2].mxu1  ;;  %1147 = vmatprep.mubr.f32.mxu0 %v4081_v18  ;;  %1217 = vmatprep.mubr.f32.mxu1 %v4083_v19 }
 0x16a   :  { %v933_v22 = vpop.f32.mrb[3].mxu0  ;;  %v1015_v25 = vpop.f32.mrb[3].mxu1  ;;  %1148 = vmatmul.mubr.f32.vlgmr.msra.gmra.mrb[4].mxu0 %v4077_v13  ;;  %1218 = vmatmul.mubr.f32.vlgmr.msra.gmra.mrb[4].mxu1 %v4079_v17 }
 0x16b   :  { %3179 = vmatpush3.bf16.msra.mxu0 %v3843_v33  ;;  %v1225_v33 = vcombine.high %v1081_v30, %v1081_v30 }
 0x16c   :  { %3181 = vmatprep.subr.bf16.mxu0 %v3855_v37  ;;  %v4106_v37 = vld [vmem:[%s4625_s3 + $0x8] sm:$0xff] }
 0x16d   :  { %2771 = vmatprep.subr.msk.mxu1 %vm1231_vm0, %v1225_v33 }
 0x16e   :  { %2772 = vmatpush1.msk.msra.mxu1 %vm1231_vm0, %v1081_v30 }
 0x16f   :  { %3183 = vmatpush3.bf16.msra.mxu0 %v3879_v47  ;;  %v3692_v47 = vmov 0.0  }
 0x170   :  { %3185 = vmatprep.subr.bf16.mxu0 %v3891_v52  ;;  %1304 = vmatprep.mubr.f32.mxu1 %v3692_v47  ;;  %v1226_v52 = vcombine.high %v4106_v37, %v4106_v37 }
 0x172   :  { %2774 = vmatprep.subr.msk.mxu1 %vm1231_vm0, %v1226_v52 }
 0x173   :  { %3187 = vmatpush3.bf16.msra.mxu0 %v3915_v60 }
 0x174   :  { %3189 = vmatprep.subr.bf16.mxu0 %v3927_v0 }
 0x177   :  { %3191 = vmatpush3.bf16.msra.mxu0 %v3951_v10 }
 0x178   :  { %3193 = vmatprep.subr.bf16.mxu0 %v3963_v14 }
 0x17b   :  { %3195 = vmatpush3.bf16.msra.mxu0 %v3987_v23 }
 0x17c   :  { %3197 = vmatprep.subr.bf16.mxu0 %v3999_v49 }
 0x17f   :  { %3199 = vmatpush3.bf16.msra.mxu0 %v3134_v41  ;;  %v3547_v41 = vld [vmem:[%s4628_s6 + $0x20] ss:$8 sps:$4 sm:$0xff]  }
 0x180   :  { %3201 = vmatprep.subr.bf16.mxu0 %v3136_v45  ;;  %v3553_v45 = vld [vmem:[%s4628_s6 + $0x40] ss:$8 sps:$4 sm:$0xff]  }
 0x183   :  { %3203 = vmatpush3.bf16.msra.mxu0 %v3138_v59  ;;  %v3565_v59 = vld [vmem:[%s4628_s6 + $0x80] ss:$8 sps:$4 sm:$0xff]  }
 0x184   :  { %3205 = vmatprep.subr.bf16.mxu0 %v3140_v63  ;;  %v3568_v63 = vld [vmem:[%s4628_s6 + $0x90] ss:$8 sps:$4 sm:$0xff]  }
 0x187   :  { %3207 = vmatpush3.bf16.msra.mxu0 %v3142_v8  ;;  %v3579_v8 = vld [vmem:[%s4628_s6 + $0xc4] ss:$8 sps:$4 sm:$0xff]  }
 0x188   :  { %2100 = vmatprep.subr.bf16.mxu0 %v3543_v32  ;;  %v2202_v32 = vld [vmem:[%s4629_s7 + $0xa0] sm:$0xff] }
 0x23d   :  { %v2882_v60 = vpop.f32.mrb[4].mxu0  ;;  %v2917_v0 = vpop.f32.mrb[4].mxu1 }
 0x23e   :  { %v2883_v10 = vpop.f32.mrb[5].mxu0  ;;  %v2918_v14 = vpop.f32.mrb[5].mxu1 }
 0x23f   :  { %v2884_v23 = vadd.f32 %v2883_v10, %v2882_v60  ;;  %v2919_v26 = vadd.f32 %v2918_v14, %v2917_v0  ;;  %v3585_v0 = vld [vmem:[%s4628_s6 + $0xe4] ss:$8 sps:$4 sm:$0xff]   ;;  %v3583_v10 = vld [vmem:[%s4628_s6 + $0xe0] ss:$8 sps:$4 sm:$0xff]   ;;  %v3588_v14 = vld [vmem:[%s4628_s6 + $0xf4] ss:$8 sps:$4 sm:$0xff]  }
 0x241   :  { %v1220_v49 = vadd.f32 %v2919_v26, %v2884_v23  ;;  %v3591_v23 = vld [vmem:[%s4628_s6 + $0x104] ss:$8 sps:$4 sm:$0xff]  }
 0x242   :  { %v2198_v26 = vld [vmem:[%s4629_s7 + $0x80] sm:$0xff] }
 0x243   :  { %2773 = vmatmul.mubr.msk.f32.vlgmr.msra.gmra.mrb[6].mxu1 %vm1227_vm1, %v1220_v49 }
 0x244   :  { %2775 = vmatpush1.msk.msra.mxu1 %vm1231_vm0, %v4106_v37  ;;  %1375 = vmatprep.mubr.f32.mxu1 %v3692_v47 }
 0x245   :  { %3209 = vmatprep.subr.bf16.mxu1 %v3841_v31 }
 0x247   :  { %2776 = vmatmul.mubr.msk.f32.vlgmr.msra.gmra.mrb[8].mxu1 %vm1227_vm1, %v1220_v49  ;;  %v2199_v49 = vld [vmem:[%s4629_s7 + $0x88] sm:$0xff] }
 0x248   :  { %3211 = vmatpush3.bf16.msra.mxu1 %v3845_v34 }
 0x249   :  { %3213 = vmatprep.subr.bf16.mxu1 %v3857_v38 }
 0x24c   :  { %3215 = vmatpush3.bf16.msra.mxu1 %v3881_v48 }
 0x24d   :  { %3217 = vmatprep.subr.bf16.mxu1 %v3893_v53 }
 0x250   :  { %3219 = vmatpush3.bf16.msra.mxu1 %v3917_v61 }
 0x251   :  { %3221 = vmatprep.subr.bf16.mxu1 %v3929_v2 }
 0x254   :  { %3223 = vmatpush3.bf16.msra.mxu1 %v3953_v11 }
 0x255   :  { %3225 = vmatprep.subr.bf16.mxu1 %v3965_v16 }
 0x258   :  { %3227 = vmatpush3.bf16.msra.mxu1 %v3989_v24 }
 0x259   :  { %3229 = vmatprep.subr.bf16.mxu1 %v4001_v27 }
 0x25c   :  { %3231 = vmatpush3.bf16.msra.mxu1 %v4023_v42  ;;  %v3552_v42 = vld [vmem:[%s4628_s6 + $0x34] ss:$8 sps:$4 sm:$0xff]  }
 0x25d   :  { %3233 = vmatprep.subr.bf16.mxu1 %v4033_v50  ;;  %v3558_v50 = vld [vmem:[%s4628_s6 + $0x54] ss:$8 sps:$4 sm:$0xff]  }
 0x260   :  { %3235 = vmatpush3.bf16.msra.mxu1 %v4054_v62  ;;  %v3570_v62 = vld [vmem:[%s4628_s6 + $0x94] ss:$8 sps:$4 sm:$0xff]  }
 0x261   :  { %3237 = vmatprep.subr.bf16.mxu1 %v4057_v3  ;;  %v3573_v3 = vld [vmem:[%s4628_s6 + $0xa4] ss:$8 sps:$4 sm:$0xff]  }
 0x264   :  { %3239 = vmatpush3.bf16.msra.mxu1 %v4073_v12  ;;  %v3582_v12 = vld [vmem:[%s4628_s6 + $0xd4] ss:$8 sps:$4 sm:$0xff]  }
 0x265   :  { %2777 = vmatprep.subr.msk.mxu1 %vm1231_vm0, %v1225_v33  ;;  %v1390_v33 = vld [vmem:[%s4626_s4] sm:$0x1] }
 0x316   :  { %v1306_v31 = vpop.f32.mrb[6].mxu1 }
 0x317   :  { %v4136_v34 = vsub.f32 %v4077_v13, %v1306_v31  ;;  %v1308_v38 = vpop.f32.mrb[7].mxu1  ;;  %v3580_v13 = vld [vmem:[%s4628_s6 + $0xd0] ss:$8 sps:$4 sm:$0xff]   ;;  %v2182_v31 = vld [vmem:[%s4629_s7] sm:$0xff] }
 0x318   :  { %v4139_v48 = vsub.f32 %v4081_v18, %v1308_v38  ;;  %v4274_v38 = vpack.c.bf16 %v2199_v49, %v2198_v26 }
 0x319   :  { %v1386_v2 = vmul.f32 %v4136_v34, %v4136_v34 }
 0x31a   :  { %v1387_v53 = vmul.f32 %v4139_v48, %v4139_v48  ;;  %v1377_v61 = vpop.f32.mrb[8].mxu1 }
 0x31b   :  { %v4146_v11 = vsub.f32 %v4079_v17, %v1377_v61  ;;  %v1379_v16 = vpop.f32.mrb[9].mxu1  ;;  %v2200_v61 = vld [vmem:[%s4629_s7 + $0x90] sm:$0xff] }
 0x31c   :  { %v4149_v24 = vsub.f32 %v4083_v19, %v1379_v16  ;;  %1455 = vmatprep.mubr.f32.mxu0 %v1387_v53  ;;  %v2183_v53 = vld [vmem:[%s4629_s7 + $0x8] sm:$0xff] }
 0x31d   :  { %1456 = vmatmul.mubr.f32.vlgmr.msra.gmra.mrb[6].mxu0 %v1386_v2  ;;  %v1388_v28 = vmul.f32 %v4146_v11, %v4146_v11  ;;  %v2201_v2 = vld [vmem:[%s4629_s7 + $0x98] sm:$0xff]  ;;  %v4285_v16 = vpack.c.bf16 %v2183_v53, %v2182_v31 }
 0x31e   :  { %v1389_v27 = vmul.f32 %v4149_v24, %v4149_v24  ;;  %2101 = vmatpush1.bf16.msra.mxu0 %v3541_v29  ;;  %v2185_v29 = vld [vmem:[%s4629_s7 + $0x18] sm:$0xff] }
 0x31f   :  { %2102 = vmatprep.subr.bf16.mxu0 %v3546_v35  ;;  %v2203_v35 = vld [vmem:[%s4629_s7 + $0xa8] sm:$0xff] }
 0x320   :  { %1525 = vmatprep.mubr.f32.mxu1 %v1389_v27  ;;  %v4287_v27 = vpack.c.bf16 %v2201_v2, %v2200_v61 }
 0x321   :  { %1526 = vmatmul.mubr.f32.vlgmr.msra.gmra.mrb[10].mxu1 %v1388_v28  ;;  %v2184_v28 = vld [vmem:[%s4629_s7 + $0x10] sm:$0xff] }
 0x322   :  { %2778 = vmatpush1.msk.msra.mxu1 %vm1231_vm0, %v1081_v30  ;;  %1600 = vmatprep.mubr.f32.mxu1 %v3692_v47 }
 0x323   :  { %2780 = vmatprep.subr.msk.mxu1 %vm1231_vm0, %v1226_v52  ;;  %2103 = vmatpush1.bf16.msra.mxu0 %v3544_v36  ;;  %v4303_v36 = vpack.c.bf16 %v2185_v29, %v2184_v28 }
 0x324   :  { %2104 = vmatprep.subr.bf16.mxu0 %v3549_v39  ;;  %v4306_v39 = vpack.c.bf16 %v2203_v35, %v2202_v32 }
 0x327   :  { %2105 = vmatpush1.bf16.msra.mxu0 %v3547_v41  ;;  %v2186_v41 = vld [vmem:[%s4629_s7 + $0x20] sm:$0xff] }
 0x328   :  { %2106 = vmatprep.subr.bf16.mxu0 %v3552_v42  ;;  %v2187_v42 = vld [vmem:[%s4629_s7 + $0x28] sm:$0xff] }
 0x32b   :  { %2107 = vmatpush1.bf16.msra.mxu0 %v3550_v43  ;;  %v2204_v43 = vld [vmem:[%s4629_s7 + $0xb0] sm:$0xff] }
 0x32c   :  { %2108 = vmatprep.subr.bf16.mxu0 %v3555_v44  ;;  %v2205_v44 = vld [vmem:[%s4629_s7 + $0xb8] sm:$0xff] }
 0x32f   :  { %2109 = vmatpush1.bf16.msra.mxu0 %v3553_v45  ;;  %v4321_v45 = vpack.c.bf16 %v2187_v42, %v2186_v41  ;;  %v3597_v41 = vld [vmem:[%s4628_s6 + $0x124] ss:$8 sps:$4 sm:$0xff]   ;;  %v3595_v42 = vld [vmem:[%s4628_s6 + $0x120] ss:$8 sps:$4 sm:$0xff]  }
 0x330   :  { %2110 = vmatprep.subr.bf16.mxu0 %v3558_v50  ;;  %v4324_v50 = vpack.c.bf16 %v2205_v44, %v2204_v43  ;;  %v3600_v43 = vld [vmem:[%s4628_s6 + $0x134] ss:$8 sps:$4 sm:$0xff]   ;;  %v3598_v44 = vld [vmem:[%s4628_s6 + $0x130] ss:$8 sps:$4 sm:$0xff]  }
 0x333   :  { %2111 = vmatpush1.bf16.msra.mxu0 %v3556_v51  ;;  %v2188_v51 = vld [vmem:[%s4629_s7 + $0x30] sm:$0xff] }
 0x334   :  { %2112 = vmatprep.subr.bf16.mxu0 %v3561_v54  ;;  %v2189_v54 = vld [vmem:[%s4629_s7 + $0x38] sm:$0xff] }
 0x337   :  { %2113 = vmatpush1.bf16.msra.mxu0 %v3559_v55  ;;  %v2206_v55 = vld [vmem:[%s4629_s7 + $0xc0] sm:$0xff] }
 0x338   :  { %2114 = vmatprep.subr.bf16.mxu0 %v3564_v56  ;;  %v2207_v56 = vld [vmem:[%s4629_s7 + $0xc8] sm:$0xff] }
 0x33b   :  { %2115 = vmatpush1.bf16.msra.mxu0 %v3562_v57  ;;  %v4339_v57 = vpack.c.bf16 %v2189_v54, %v2188_v51  ;;  %v3603_v51 = vld [vmem:[%s4628_s6 + $0x144] ss:$8 sps:$4 sm:$0xff]   ;;  %v3601_v54 = vld [vmem:[%s4628_s6 + $0x140] ss:$8 sps:$4 sm:$0xff]  }
 0x33c   :  { %2116 = vmatprep.subr.bf16.mxu0 %v3567_v58  ;;  %v4342_v58 = vpack.c.bf16 %v2207_v56, %v2206_v55  ;;  %v3606_v55 = vld [vmem:[%s4628_s6 + $0x154] ss:$8 sps:$4 sm:$0xff]   ;;  %v3604_v56 = vld [vmem:[%s4628_s6 + $0x150] ss:$8 sps:$4 sm:$0xff]  }
 0x33f   :  { %2117 = vmatpush1.bf16.msra.mxu0 %v3565_v59  ;;  %v2190_v59 = vld [vmem:[%s4629_s7 + $0x40] sm:$0xff] }
 0x340   :  { %2118 = vmatprep.subr.bf16.mxu0 %v3570_v62  ;;  %v2191_v62 = vld [vmem:[%s4629_s7 + $0x48] sm:$0xff] }
 0x343   :  { %2119 = vmatpush1.bf16.msra.mxu0 %v3568_v63  ;;  %v2208_v63 = vld [vmem:[%s4629_s7 + $0xd0] sm:$0xff] }
 0x344   :  { %2120 = vmatprep.subr.bf16.mxu0 %v3573_v3  ;;  %v2209_v3 = vld [vmem:[%s4629_s7 + $0xd8] sm:$0xff] }
 0x347   :  { %2121 = vmatpush1.bf16.msra.mxu0 %v3571_v4  ;;  %v4357_v4 = vpack.c.bf16 %v2191_v62, %v2190_v59  ;;  %v3609_v59 = vld [vmem:[%s4628_s6 + $0x164] ss:$8 sps:$4 sm:$0xff]   ;;  %v3607_v62 = vld [vmem:[%s4628_s6 + $0x160] ss:$8 sps:$4 sm:$0xff]  }
 0x348   :  { %2122 = vmatprep.subr.bf16.mxu0 %v3576_v6  ;;  %v4360_v6 = vpack.c.bf16 %v2209_v3, %v2208_v63  ;;  %v3612_v63 = vld [vmem:[%s4628_s6 + $0x174] ss:$8 sps:$4 sm:$0xff]   ;;  %v3610_v3 = vld [vmem:[%s4628_s6 + $0x170] ss:$8 sps:$4 sm:$0xff]  }
 0x34b   :  { %2123 = vmatpush1.bf16.msra.mxu0 %v3574_v7  ;;  %v2192_v7 = vld [vmem:[%s4629_s7 + $0x50] sm:$0xff] }
 0x34c   :  { %2124 = vmatprep.subr.bf16.mxu0 %v3579_v8  ;;  %v2193_v8 = vld [vmem:[%s4629_s7 + $0x58] sm:$0xff] }
 0x34f   :  { %2125 = vmatpush1.bf16.msra.mxu0 %v3577_v9  ;;  %v2210_v9 = vld [vmem:[%s4629_s7 + $0xe0] sm:$0xff] }
 0x350   :  { %2126 = vmatprep.subr.bf16.mxu0 %v3582_v12  ;;  %v2211_v12 = vld [vmem:[%s4629_s7 + $0xe8] sm:$0xff] }
 0x353   :  { %2127 = vmatpush1.bf16.msra.mxu0 %v3580_v13  ;;  %v4375_v13 = vpack.c.bf16 %v2193_v8, %v2192_v7  ;;  %v3615_v7 = vld [vmem:[%s4628_s6 + $0x184] ss:$8 sps:$4 sm:$0xff]   ;;  %v3613_v8 = vld [vmem:[%s4628_s6 + $0x180] ss:$8 sps:$4 sm:$0xff]  }
 0x354   :  { %2128 = vmatprep.subr.bf16.mxu0 %v3585_v0 }
 0x357   :  { %2129 = vmatpush1.bf16.msra.mxu0 %v3583_v10 }
 0x358   :  { %2130 = vmatprep.subr.bf16.mxu0 %v3588_v14 }
 0x3f0   :  { %v2952_v17 = vpop.f32.mrb[6].mxu0 }
 0x3f1   :  { %v2953_v18 = vpop.f32.mrb[7].mxu0 }
 0x3f2   :  { %v2954_v19 = vadd.f32 %v2953_v18, %v2952_v17  ;;  %v4378_v17 = vpack.c.bf16 %v2211_v12, %v2210_v9  ;;  %v2194_v18 = vld [vmem:[%s4629_s7 + $0x60] sm:$0xff]  ;;  %v3618_v9 = vld [vmem:[%s4628_s6 + $0x194] ss:$8 sps:$4 sm:$0xff]   ;;  %v3616_v12 = vld [vmem:[%s4628_s6 + $0x190] ss:$8 sps:$4 sm:$0xff]  }
 0x3f4   :  { %v2987_v20 = vpop.f32.mrb[10].mxu1  ;;  %v1458_v22 = vadd.f32 1e-05, %v2954_v19  ;;  %v2195_v19 = vld [vmem:[%s4629_s7 + $0x68] sm:$0xff] }
 0x3f5   :  { %v2988_v21 = vpop.f32.mrb[11].mxu1 }
 0x3f6   :  { %v2989_v25 = vadd.f32 %v2988_v21, %v2987_v20  ;;  %v2212_v20 = vld [vmem:[%s4629_s7 + $0xf0] sm:$0xff]  ;;  %v2213_v21 = vld [vmem:[%s4629_s7 + $0xf8] sm:$0xff] }
 0x3f8   :  { %v1528_v30 = vadd.f32 %v2989_v25, %v1458_v22  ;;  %v4393_v22 = vpack.c.bf16 %v2195_v19, %v2194_v18  ;;  %v4396_v25 = vpack.c.bf16 %v2213_v21, %v2212_v20  ;;  %v3621_v18 = vld [vmem:[%s4628_s6 + $0x1a4] ss:$8 sps:$4 sm:$0xff]   ;;  %v3619_v19 = vld [vmem:[%s4628_s6 + $0x1a0] ss:$8 sps:$4 sm:$0xff]   ;;  %v3624_v20 = vld [vmem:[%s4628_s6 + $0x1b4] ss:$8 sps:$4 sm:$0xff]  }
 0x3f9   :  { %v3622_v21 = vld [vmem:[%s4628_s6 + $0x1b0] ss:$8 sps:$4 sm:$0xff]  }
 0x3fa   :  { %3637 = vrsqrt.f32 %v1528_v30  ;;  %v1682_v30 = vld [vmem:[%s4627_s5] sm:$0xf] }
 0x3fb   :  { %v1699_v31 = vrot.slane %v1682_v30, %v75_v5 }
 0x404   :  { %v3638_v52 = vpop.eup %3637 }
 0x405   :  { %v1532_v60 = vmul.f32 %v3638_v52, %v1390_v33  ;;  %v1687_v33 = vrot.slane %v1682_v30, %v3791_v1 }
 0x407   :  { %2779 = vmatmul.mubr.msk.f32.vlgmr.msra.gmra.mrb[12].mxu1 %vm1227_vm1, %v1532_v60 }
 0x408   :  { %2781 = vmatpush1.msk.msra.mxu1 %vm1231_vm0, %v4106_v37  ;;  %1671 = vmatprep.mubr.f32.mxu1 %v3692_v47  ;;  %v3586_v37 = vld [vmem:[%s4628_s6 + $0xf0] ss:$8 sps:$4 sm:$0xff]  }
 0x409   :  { %2131 = vmatpush1.bf16.msra.mxu0 %v3586_v37  ;;  %3241 = vmatprep.subr.bf16.mxu1 %v4274_v38 }
 0x40a   :  { %2141 = vmatprep.subr.bf16.mxu0 %v3591_v23  ;;  %v1695_v23 = vrot.slane %v1682_v30, %v71_v15  ;;  %v3589_v15 = vld [vmem:[%s4628_s6 + $0x100] ss:$8 sps:$4 sm:$0xff]  }
 0x40b   :  { %2782 = vmatmul.mubr.msk.f32.vlgmr.msra.gmra.mrb[14].mxu1 %vm1227_vm1, %v1532_v60  ;;  %v1691_v60 = vrot.slane %v1682_v30, %v3781_v46  ;;  %v3627_v30 = vld [vmem:[%s4628_s6 + $0x1c4] ss:$8 sps:$4 sm:$0xff]  }
 0x40c   :  { %3243 = vmatpush3.bf16.msra.mxu1 %v4285_v16 }
 0x40d   :  { %3245 = vmatprep.subr.bf16.mxu1 %v4287_v27 }
 0x410   :  { %3247 = vmatpush3.bf16.msra.mxu1 %v4303_v36 }
 0x411   :  { %3249 = vmatprep.subr.bf16.mxu1 %v4306_v39 }
 0x414   :  { %3251 = vmatpush3.bf16.msra.mxu1 %v4321_v45 }
 0x415   :  { %3253 = vmatprep.subr.bf16.mxu1 %v4324_v50 }
 0x418   :  { %3255 = vmatpush3.bf16.msra.mxu1 %v4339_v57 }
 0x419   :  { %3257 = vmatprep.subr.bf16.mxu1 %v4342_v58 }
 0x41c   :  { %3259 = vmatpush3.bf16.msra.mxu1 %v4357_v4 }
 0x41d   :  { %3261 = vmatprep.subr.bf16.mxu1 %v4360_v6 }
 0x420   :  { %3263 = vmatpush3.bf16.msra.mxu1 %v4375_v13 }
 0x421   :  { %3265 = vmatprep.subr.bf16.mxu1 %v4378_v17 }
 0x424   :  { %3267 = vmatpush3.bf16.msra.mxu1 %v4393_v22 }
 0x425   :  { %3269 = vmatprep.subr.bf16.mxu1 %v4396_v25 }
 0x4da   :  { %v1602_v52 = vpop.f32.mrb[12].mxu1 }
 0x4db   :  { %v1678_v0 = vmul.f32 %v1602_v52, %v4136_v34  ;;  %v1604_v10 = vpop.f32.mrb[13].mxu1  ;;  %v3630_v52 = vld [vmem:[%s4628_s6 + $0x1d4] ss:$8 sps:$4 sm:$0xff]  }
 0x4dc   :  { %v1679_v14 = vmul.f32 %v1604_v10, %v4139_v48  ;;  %v3631_v10 = vld [vmem:[%s4628_s6 + $0x1e0] ss:$8 sps:$4 sm:$0xff]  }
 0x4dd   :  { %v1704_v37 = vadd.f32 %v1687_v33, %v1678_v0  ;;  %v3625_v33 = vld [vmem:[%s4628_s6 + $0x1c0] ss:$8 sps:$4 sm:$0xff]   ;;  %v3633_v0 = vld [vmem:[%s4628_s6 + $0x1e4] ss:$8 sps:$4 sm:$0xff]  }
 0x4de   :  { %v1705_v26 = vadd.f32 %v1691_v60, %v1679_v14  ;;  %v1673_v49 = vpop.f32.mrb[14].mxu1  ;;  %v3628_v60 = vld [vmem:[%s4628_s6 + $0x1d0] ss:$8 sps:$4 sm:$0xff]   ;;  %v3636_v14 = vld [vmem:[%s4628_s6 + $0x1f4] ss:$8 sps:$4 sm:$0xff]  }
 0x4df   :  { %v1708_v53 = vmax.f32 %v1704_v37, 0.0  ;;  %v1680_v61 = vmul.f32 %v1673_v49, %v4146_v11  ;;  %v1675_v2 = vpop.f32.mrb[15].mxu1  ;;  %v3634_v37 = vld [vmem:[%s4628_s6 + $0x1f0] ss:$8 sps:$4 sm:$0xff]  }
 0x4e0   :  { %v1709_v28 = vmax.f32 %v1705_v26, 0.0  ;;  %v1681_v29 = vmul.f32 %v1675_v2, %v4149_v24  ;;  %v3592_v24 = vld [vmem:[%s4628_s6 + $0x110] ss:$8 sps:$4 sm:$0xff]  }
 0x4e1   :  { %v4413_v34 = vadd.f32 %v1695_v23, %v1680_v61  ;;  %v1712_v35 = vpack.c.bf16 %v1708_v53, %v1708_v53  ;;  %v2196_v49 = vld [vmem:[%s4629_s7 + $0x70] sm:$0xff]  ;;  %v2215_v61 = vld [vmem:[%s4630_s8 + $0x8] sm:$0xff] }
 0x4e2   :  { %v1713_v32 = vpack.c.bf16 %v1709_v28, %v1709_v28  ;;  %v1707_v48 = vadd.f32 %v1699_v31, %v1681_v29  ;;  %v2197_v31 = vld [vmem:[%s4629_s7 + $0x78] sm:$0xff] }
 0x4e3   :  { %v1710_v23 = vmax.f32 %v4413_v34, 0.0  ;;  %v3270_v53 = vpack.c.bf16 %v2197_v31, %v2196_v49 }
 0x4e4   :  { %v1711_v5 = vmax.f32 %v1707_v48, 0.0  ;;  %2132 = vmatprep.mubr.bf16.mxu0 %v1713_v32  ;;  %v2214_v32 = vld [vmem:[%s4630_s8] sm:$0xff] }
 0x4e5   :  { %2133 = vmatmul.mubr.bf16.vlgmr.msra.gmra.mrb[8].mxu0 %v1712_v35  ;;  %v1714_v26 = vpack.c.bf16 %v1710_v23, %v1710_v23  ;;  %3271 = vmatpush3.bf16.msra.mxu1 %v3270_v53 }
 0x4e6   :  { %v1715_v11 = vpack.c.bf16 %v1711_v5, %v1711_v5  ;;  %2142 = vmatpush1.bf16.msra.mxu0 %v3589_v15  ;;  %2290 = vmatprep.subr.mxu1 %v2215_v61 }
 0x4e7   :  { %2143 = vmatprep.subr.bf16.mxu0 %v3594_v40 }
 0x4e8   :  { %2173 = vmatprep.mubr.bf16.mxu0 %v1715_v11  ;;  %v2535_v11 = vld [vmem:[%s4633_s11 + $0x10] sm:$0xff] }
 0x4ea   :  { %2144 = vmatpush1.bf16.msra.mxu0 %v3592_v24  ;;  %v2536_v24 = vld [vmem:[%s4633_s11 + $0x18] sm:$0xff] }
 0x4eb   :  { %2145 = vmatprep.subr.bf16.mxu0 %v3597_v41  ;;  %v3308_v41 = vpack.c.bf16 %v2536_v24, %v2535_v11 }
 0x4ee   :  { %2146 = vmatpush1.bf16.msra.mxu0 %v3595_v42  ;;  %v2537_v42 = vld [vmem:[%s4633_s11 + $0x20] sm:$0xff] }
 0x4ef   :  { %2147 = vmatprep.subr.bf16.mxu0 %v3600_v43  ;;  %v2538_v43 = vld [vmem:[%s4633_s11 + $0x28] sm:$0xff] }
 0x4f2   :  { %2148 = vmatpush1.bf16.msra.mxu0 %v3598_v44  ;;  %v3311_v44 = vpack.c.bf16 %v2538_v43, %v2537_v42 }
 0x4f3   :  { %2149 = vmatprep.subr.bf16.mxu0 %v3603_v51  ;;  %v2539_v51 = vld [vmem:[%s4633_s11 + $0x30] sm:$0xff] }
 0x4f6   :  { %2150 = vmatpush1.bf16.msra.mxu0 %v3601_v54  ;;  %v2540_v54 = vld [vmem:[%s4633_s11 + $0x38] sm:$0xff] }
 0x4f7   :  { %2151 = vmatprep.subr.bf16.mxu0 %v3606_v55  ;;  %v3314_v55 = vpack.c.bf16 %v2540_v54, %v2539_v51 }
 0x4fa   :  { %2152 = vmatpush1.bf16.msra.mxu0 %v3604_v56  ;;  %v2541_v56 = vld [vmem:[%s4633_s11 + $0x40] sm:$0xff] }
 0x4fb   :  { %2153 = vmatprep.subr.bf16.mxu0 %v3609_v59  ;;  %v2542_v59 = vld [vmem:[%s4633_s11 + $0x48] sm:$0xff] }
 0x4fe   :  { %2154 = vmatpush1.bf16.msra.mxu0 %v3607_v62  ;;  %v3317_v62 = vpack.c.bf16 %v2542_v59, %v2541_v56 }
 0x4ff   :  { %2155 = vmatprep.subr.bf16.mxu0 %v3612_v63  ;;  %v2543_v63 = vld [vmem:[%s4633_s11 + $0x50] sm:$0xff] }
 0x502   :  { %2156 = vmatpush1.bf16.msra.mxu0 %v3610_v3  ;;  %v2544_v3 = vld [vmem:[%s4633_s11 + $0x58] sm:$0xff] }
 0x503   :  { %2157 = vmatprep.subr.bf16.mxu0 %v3615_v7  ;;  %v3320_v7 = vpack.c.bf16 %v2544_v3, %v2543_v63 }
 0x506   :  { %2158 = vmatpush1.bf16.msra.mxu0 %v3613_v8  ;;  %v2545_v8 = vld [vmem:[%s4633_s11 + $0x60] sm:$0xff] }
 0x507   :  { %2159 = vmatprep.subr.bf16.mxu0 %v3618_v9  ;;  %v2546_v9 = vld [vmem:[%s4633_s11 + $0x68] sm:$0xff] }
 0x50a   :  { %2160 = vmatpush1.bf16.msra.mxu0 %v3616_v12  ;;  %v3323_v12 = vpack.c.bf16 %v2546_v9, %v2545_v8 }
 0x50b   :  { %2161 = vmatprep.subr.bf16.mxu0 %v3621_v18  ;;  %v2547_v18 = vld [vmem:[%s4633_s11 + $0x70] sm:$0xff] }
 0x50e   :  { %2162 = vmatpush1.bf16.msra.mxu0 %v3619_v19  ;;  %v2548_v19 = vld [vmem:[%s4633_s11 + $0x78] sm:$0xff] }
 0x50f   :  { %2163 = vmatprep.subr.bf16.mxu0 %v3624_v20  ;;  %v3326_v20 = vpack.c.bf16 %v2548_v19, %v2547_v18 }
 0x512   :  { %2164 = vmatpush1.bf16.msra.mxu0 %v3622_v21  ;;  %v2514_v21 = vld [vmem:[%s4632_s10] sm:$0x3] }
 0x513   :  { %2165 = vmatprep.subr.bf16.mxu0 %v3627_v30  ;;  %v2519_v30 = vrot.slane %v2514_v21, %v3791_v1  ;;  %v2849_v1 = vld [vmem:[%s4634_s12] ss:$0 sm:$0xff] }
 0x516   :  { %2166 = vmatpush1.bf16.msra.mxu0 %v3625_v33 }
 0x517   :  { %2167 = vmatprep.subr.bf16.mxu0 %v3630_v52  ;;  %v2523_v52 = vrot.slane %v2514_v21, %v3781_v46 }
 0x51a   :  { %2168 = vmatpush1.bf16.msra.mxu0 %v3628_v60 }
 0x51b   :  { %2169 = vmatprep.subr.bf16.mxu0 %v3633_v0 }
 0x51e   :  { %2170 = vmatpush1.bf16.msra.mxu0 %v3631_v10 }
 0x51f   :  { %2171 = vmatprep.subr.bf16.mxu0 %v3636_v14 }
 0x522   :  { %2172 = vmatpush1.bf16.msra.mxu0 %v3634_v37 }
 0x525   :  { %2174 = vmatmul.mubr.bf16.vlgmr.msra.gmra.mrb[8].mxu0 %v1714_v26 }
 0x5f8   :  { %v2175_v2 = vpop.f32.mrb[8].mxu0 }
 0x5f9   :  { %v2177_v28 = vpop.f32.mrb[9].mxu0 }
 0x5fa   :  { %v2179_v29 = vpop.f32.mrb[10].mxu0  ;;  %2280 = vmatprep.mubr.f32.mxu1 %v2177_v28 }
 0x5fb   :  { %v2180_v34 = vpop.f32.mrb[11].mxu0  ;;  %2281 = vmatmul.mubr.f32.vlgmr.msra.gmra.mrb[16].mxu1 %v2175_v2 }
 0x5fc   :  { %2354 = vmatprep.mubr.f32.mxu1 %v3692_v47  ;;  %2291 = vmatpush1.msra.mxu1 %v2214_v32 }
 0x5fd   :  { %3273 = vmatprep.subr.bf16.mxu1 %v4274_v38 }
 0x6ce   :  { %v3022_v48 = vpop.f32.mrb[16].mxu1 }
 0x6cf   :  { %v3023_v15 = vpop.f32.mrb[17].mxu1 }
 0x6d0   :  { %v3024_v35 = vadd.f32 %v3023_v15, %v3022_v48 }
 0x6d2   :  { %2847 = vmatmul.mubr.msk.f32.vlgmr.msra.gmra.mrb[18].mxu1 %vm2286_vm2, %v3024_v35 }
 0x6d3   :  { %3275 = vmatpush3.bf16.msra.mxu1 %v4285_v16 }
 0x6d4   :  { %3277 = vmatprep.subr.bf16.mxu1 %v4287_v27 }
 0x6d7   :  { %3279 = vmatpush3.bf16.msra.mxu1 %v4303_v36 }
 0x6d8   :  { %3281 = vmatprep.subr.bf16.mxu1 %v4306_v39 }
 0x6db   :  { %3283 = vmatpush3.bf16.msra.mxu1 %v4321_v45 }
 0x6dc   :  { %3285 = vmatprep.subr.bf16.mxu1 %v4324_v50  ;;  %v3693_v50 = vmov 0.0|0.0  }
 0x6df   :  { %3287 = vmatpush3.bf16.msra.mxu1 %v4339_v57 }
 0x6e0   :  { %3289 = vmatprep.subr.bf16.mxu1 %v4342_v58 }
 0x6e3   :  { %3291 = vmatpush3.bf16.msra.mxu1 %v4357_v4 }
 0x6e4   :  { %3293 = vmatprep.subr.bf16.mxu1 %v4360_v6 }
 0x6e7   :  { %3295 = vmatpush3.bf16.msra.mxu1 %v4375_v13  ;;  %v2533_v13 = vld [vmem:[%s4633_s11] sm:$0xff] }
 0x6e8   :  { %3297 = vmatprep.subr.bf16.mxu1 %v4378_v17  ;;  %v2534_v17 = vld [vmem:[%s4633_s11 + $0x8] sm:$0xff] }
 0x6e9   :  { %v3305_v40 = vpack.c.bf16 %v2534_v17, %v2533_v13 }
 0x6eb   :  { %3299 = vmatpush3.bf16.msra.mxu1 %v4393_v22  ;;  %v2365_v22 = vld [vmem:[%s4631_s9] sm:$0x1] }
 0x6ec   :  { %3301 = vmatprep.subr.bf16.mxu1 %v4396_v25 }
 0x6ef   :  { %3303 = vmatpush3.bf16.msra.mxu1 %v3270_v53 }
 0x6f0   :  { %2441 = vmatprep.subr.mxu1 %v2215_v61 }
 0x7a5   :  { %v2356_v38 = vpop.f32.mrb[18].mxu1 }
 0x7a6   :  { %v4538_v16 = vsub.f32 %v2175_v2, %v2356_v38  ;;  %v2358_v27 = vpop.f32.mrb[19].mxu1 }
 0x7a7   :  { %v4540_v36 = vsub.f32 %v2177_v28, %v2358_v27 }
 0x7a8   :  { %v2363_v45 = vmul.f32 %v4538_v16, %v4538_v16 }
 0x7a9   :  { %v2364_v39 = vmul.f32 %v4540_v36, %v4540_v36 }
 0x7ab   :  { %2430 = vmatprep.mubr.f32.mxu1 %v2364_v39 }
 0x7ac   :  { %2431 = vmatmul.mubr.f32.vlgmr.msra.gmra.mrb[20].mxu1 %v2363_v45 }
 0x7ad   :  { %2442 = vmatpush1.msra.mxu1 %v2214_v32  ;;  %2505 = vmatprep.mubr.f32.mxu1 %v3692_v47 }
 0x7ae   :  { %3304 = vmatprep.subr.bf16.mxu1 %v3693_v50 }
 0x87f   :  { %v3057_v57 = vpop.f32.mrb[20].mxu1 }
 0x880   :  { %v3058_v58 = vpop.f32.mrb[21].mxu1 }
 0x881   :  { %v3059_v4 = vadd.f32 %v3058_v58, %v3057_v57 }
 0x883   :  { %v2433_v6 = vadd.f32 1e-05, %v3059_v4 }
 0x885   :  { %3639 = vrsqrt.f32 %v2433_v6 }
 0x88f   :  { %v3640_v25 = vpop.eup %3639 }
 0x890   :  { %v2437_v5 = vmul.f32 %v3640_v25, %v2365_v22 }
 0x892   :  { %2848 = vmatmul.mubr.msk.f32.vlgmr.msra.gmra.mrb[22].mxu1 %vm2286_vm2, %v2437_v5 }
 0x893   :  { %3306 = vmatpush3.bf16.msra.mxu1 %v3305_v40  ;;  %3109 = vmatprep.mubr.msk.f32.mxu1 %vm3694_vm3, %v3692_v47 }
 0x894   :  { %3307 = vmatprep.subr.bf16.mxu1 %v3693_v50 }
 0x897   :  { %3309 = vmatpush3.bf16.msra.mxu1 %v3308_v41 }
 0x898   :  { %3310 = vmatprep.subr.bf16.mxu1 %v3693_v50 }
 0x89b   :  { %3312 = vmatpush3.bf16.msra.mxu1 %v3311_v44 }
 0x89c   :  { %3313 = vmatprep.subr.bf16.mxu1 %v3693_v50 }
 0x89f   :  { %3315 = vmatpush3.bf16.msra.mxu1 %v3314_v55 }
 0x8a0   :  { %3316 = vmatprep.subr.bf16.mxu1 %v3693_v50 }
 0x8a3   :  { %3318 = vmatpush3.bf16.msra.mxu1 %v3317_v62 }
 0x8a4   :  { %3319 = vmatprep.subr.bf16.mxu1 %v3693_v50 }
 0x8a7   :  { %3321 = vmatpush3.bf16.msra.mxu1 %v3320_v7 }
 0x8a8   :  { %3322 = vmatprep.subr.bf16.mxu1 %v3693_v50 }
 0x8ab   :  { %3324 = vmatpush3.bf16.msra.mxu1 %v3323_v12 }
 0x8ac   :  { %3325 = vmatprep.subr.bf16.mxu1 %v3693_v50 }
 0x8af   :  { %3327 = vmatpush3.bf16.msra.mxu1 %v3326_v20 }
 0x965   :  { %v2507_v33 = vpop.f32.mrb[22].mxu1 }
 0x966   :  { %v2512_v60 = vmul.f32 %v2507_v33, %v4538_v16  ;;  %v2509_v0 = vpop.f32.mrb[23].mxu1 }
 0x967   :  { %v2513_v10 = vmul.f32 %v2509_v0, %v4540_v36 }
 0x968   :  { %v2526_v14 = vadd.f32 %v2519_v30, %v2512_v60 }
 0x969   :  { %v2527_v37 = vadd.f32 %v2523_v52, %v2513_v10 }
 0x96a   :  { %v2528_v23 = vmax.f32 %v2526_v14, 0.0 }
 0x96b   :  { %v2529_v47 = vmax.f32 %v2527_v37, 0.0 }
 0x96c   :  { %2530 = vst [vmem:[#allocation2] sm:$0x1] %v2528_v23 }
 0x96d   :  { %2531 = vst [vmem:[#allocation2 + $0x1] sm:$0x1] %v2529_v47 }
 0x974   :  { %v2532_v26 = vld [vmem:[#allocation2] sm:$0x3] }
 0x975   :  { %3110 = vmatmul.mubr.f32.vlgmr.msra.gmra.mrb[24].mxu1 %v2532_v26 }
 0xa48   :  { %v2622_v46 = vpop.f32.mrb[24].mxu1 }
 0xa49   :  { %v2623_v49 = vadd.f32 %v2849_v1, %v2622_v46  ;;  %v3111_v31 = vpop.f32.mrb[25].mxu1 }
 0xa4b   :  { %2627 = vst.msk [vmem:[#allocation6] sm:$0x3] %vm2626_vm4, %v2623_v49 }
 0xa4c   :  { %3674 = shalt.err (!%p3671_p12)
}
 0xa4d   :  { %s3675_s29 = scalar_lea.hbm %s4635_s13, 32 }
 0xa4e   :  { %p3676_p13 = scmp.ne.s32.totalorder %s4635_s13, %s3675_s29  ;;  %p3679_p0 = scmp.lt.u32.totalorder %s3675_s29, %s4635_s13 }
 0xa50   :  { %p3681_p1 = pnand %p3679_p0, %p3676_p13 }
 0xa52   :  { %3684 = shalt.err (!%p3681_p1)
}
 0xa53   :  { %2637 = dma.vmem_to_hbm [thread:$0]  %s2635_s26, 32, %s4635_s13, [#allocation5]  }
 0xa54   :  { %3687 = dma.done.wait [#allocation5], 32  }
 0xa55   :  { %3688 = vsyncadd [#allocation5], 4294967264 }
 0xa56   :  { %2641 = vsyncpa [#allocation4], 1 }
 0xa57   :  { %2642 = vsyncpa [#allocation5], 1 }

</bundles_post_ra>
